<compile_context>
chip_gen: v5e
topology: v5e:2x2
jax: 0.10.0
libtpu: 0.0.40
codegen_flags: <defaults>
</compile_context>

<pallas_src>
import functools

import jax
import jax.numpy as jnp
from jax.experimental import pallas as pl
from jax.experimental.pallas import tpu as pltpu


# --------------------------------------------------------------------------- kernel

def _dp_kernel(x_ref, z_ref, m_ref,
               wz_ref, w1_ref, w2_ref,
               pin_ref, pf_ref,
               o_ref,
               *, K, T, N, eps):
    pad = K // 2
    x = x_ref[...]        # (Cin, N) f32, N = B*T (batch folded on lane axis)
    z = z_ref[...]        # (Cin, N) f32
    mask = m_ref[...]     # (1,  N)  f32 (exact 0/1)

    # Position within each length-T batch segment (for conv edge masking).
    pos = jax.lax.broadcasted_iota(jnp.int32, (1, N), 1) % T

    def layer_norm(h, g, b):
        # modules.LayerNorm: normalize over the channel (sublane) axis per time step.
        mu = jnp.mean(h, axis=0, keepdims=True)
        var = jnp.mean(jnp.square(h - mu), axis=0, keepdims=True)
        return (h - mu) * jax.lax.rsqrt(var + eps) * g + b

    def conv_same(h, w_ref, b):
        # 'same' Conv1d as K accumulated matmuls on roll-shifted activations.
        # Tap k reads h[:, t + (k - pad)]; segment-edge positions (zero padding in the
        # reference, and batch-boundary wrap-around from the folded layout) are masked.
        acc = None
        for k in range(K):
            s = k - pad
            if s == 0:
                hk = h
            else:
                hk = pltpu.roll(h, shift=(-s) % N, axis=1)
                if s > 0:
                    hk = jnp.where(pos < T - s, hk, 0.0)
                else:
                    hk = jnp.where(pos >= -s, hk, 0.0)
            term = jnp.dot(w_ref[k], hk, preferred_element_type=jnp.float32)
            acc = term if acc is None else acc + term
        return acc + b

    # z = norm_z1(conv_z1(z * x_mask))   (mask before the 1x1 conv is redundant: the
    # later (x + z) * x_mask zeroes masked positions and LayerNorm is per-position)
    zz = jnp.dot(wz_ref[...], z, preferred_element_type=jnp.float32) + pin_ref[:, 0:1]
    zz = layer_norm(zz, pin_ref[:, 1:2], pin_ref[:, 2:3])

    # x = drop(norm_1(relu(conv_1((x + z) * x_mask))))
    # TODO(synk): train-mode dropout not implemented; inference dropout == identity.
    h = conv_same((x + zz) * mask, w1_ref, pf_ref[:, 0:1])
    h = layer_norm(jnp.maximum(h, 0.0), pf_ref[:, 1:2], pf_ref[:, 2:3])

    # x = drop(norm_2(relu(conv_2(x * x_mask))))
    h = conv_same(h * mask, w2_ref, pf_ref[:, 3:4])
    h = layer_norm(jnp.maximum(h, 0.0), pf_ref[:, 4:5], pf_ref[:, 5:6])

    # proj(x * x_mask) * x_mask  (1x1 conv to 1 channel == channel-weighted reduce;
    # inner mask multiply is redundant given the final y * mask)
    y = jnp.sum(h * pf_ref[:, 6:7], axis=0, keepdims=True) + pf_ref[0:1, 7:8]
    o_ref[...] = y * mask


# --------------------------------------------------------------------------- wrapper

def duration_predictor(x, x_mask, z, params, *, kernel_size, eps=1e-5):
    """Fused DurationPredictor.forward (g=None path).  x, z: (B, Cin, T); x_mask: (B, 1, T)."""
    B, Cin, T = x.shape
    Cf = params['w1'].shape[0]
    K = kernel_size
    N = B * T

    # Fold batch onto the lane axis: (B, C, T) -> (C, B*T)
    fold = lambda a: jnp.transpose(jnp.asarray(a, jnp.float32), (1, 0, 2)).reshape(a.shape[1], N)
    x_f, z_f, m_f = fold(x), fold(z), fold(x_mask)

    # Conv weights: (Cout, Cin, K) -> (K, Cout, Cin) so tap k is a static leading index.
    w_tap = lambda w: jnp.transpose(jnp.asarray(w, jnp.float32), (2, 0, 1))
    wz = jnp.asarray(params['wz'], jnp.float32)                 # (Cin, Cin)
    w1 = w_tap(params['w1'])                                    # (K, Cf, Cin)
    w2 = w_tap(params['w2'])                                    # (K, Cf, Cf)

    # Pack small per-channel params into two slabs.
    col = lambda v: jnp.asarray(v, jnp.float32).reshape(-1)
    p_in = jnp.stack([col(params['bz']), col(params['gz']), col(params['betz'])], axis=1)   # (Cin, 3)
    bp_col = jnp.full((Cf,), jnp.asarray(params['bp'], jnp.float32).reshape(())[()])
    p_f = jnp.stack([col(params['b1']), col(params['g1']), col(params['bet1']),
                     col(params['b2']), col(params['g2']), col(params['bet2']),
                     col(params['wp']), bp_col], axis=1)                                     # (Cf, 8)

    full2 = lambda r, c: pl.BlockSpec((r, c), lambda i: (0, 0))
    full3 = lambda a, b, c: pl.BlockSpec((a, b, c), lambda i: (0, 0, 0))

    kernel = functools.partial(_dp_kernel, K=K, T=T, N=N, eps=eps)
    out = pl.pallas_call(
        kernel,
        out_shape=jax.ShapeDtypeStruct((1, N), jnp.float32),
        grid=(1,),
        in_specs=[
            full2(Cin, N), full2(Cin, N), full2(1, N),
            full2(Cin, Cin), full3(K, Cf, Cin), full3(K, Cf, Cf),
            full2(Cin, 3), full2(Cf, 8),
        ],
        out_specs=full2(1, N),
        compiler_params=pltpu.CompilerParams(dimension_semantics=("arbitrary",)),
    )(x_f, z_f, m_f, wz, w1, w2, p_in, p_f)

    # (1, B*T) -> (B, 1, T)
    return jnp.transpose(out.reshape(1, B, T), (1, 0, 2))


# --------------------------------------------------------------------------- pure-JAX reference

def duration_predictor_reference(x, x_mask, z, params, *, kernel_size, eps=1e-5):
    K = kernel_size
    pad = K // 2
    T = x.shape[-1]

    def conv1d(h, w, b):                         # PyTorch Conv1d (cross-correlation), 'same' pad
        hp = jnp.pad(h, ((0, 0), (0, 0), (pad, pad)))
        out = sum(jnp.einsum('oc,bct->bot', w[:, :, k], hp[:, :, k:k + T]) for k in range(K))
        return out + b[None, :, None]

    def pw(h, w, b):
        return jnp.einsum('oc,bct->bot', w, h) + b[None, :, None]

    def ln(h, g, bt):
        mu = jnp.mean(h, axis=1, keepdims=True)
        var = jnp.mean(jnp.square(h - mu), axis=1, keepdims=True)
        return (h - mu) / jnp.sqrt(var + eps) * g[None, :, None] + bt[None, :, None]

    zz = ln(pw(z * x_mask, params['wz'], params['bz']), params['gz'], params['betz'])
    h = conv1d((x + zz) * x_mask, params['w1'], params['b1'])
    h = ln(jax.nn.relu(h), params['g1'], params['bet1'])
    h = conv1d(h * x_mask, params['w2'], params['b2'])
    h = ln(jax.nn.relu(h), params['g2'], params['bet2'])
    y = pw(h * x_mask, params['wp'], params['bp'])
    return y * x_mask


# --------------------------------------------------------------------------- main

if __name__ == "__main__":
    B, Cin, Cf, K, T = 2, 8, 32, 3, 128   # in_channels=8, filter_channels=32, kernel_size=3

    key = jax.random.PRNGKey(0)
    ks = jax.random.split(key, 16)
    nrm = lambda k, shape, s=0.1: s * jax.random.normal(k, shape, dtype=jnp.float32)

    params = dict(
        wz=nrm(ks[0], (Cin, Cin)), bz=nrm(ks[1], (Cin,)),
        gz=1.0 + nrm(ks[2], (Cin,)), betz=nrm(ks[3], (Cin,)),
        w1=nrm(ks[4], (Cf, Cin, K)), b1=nrm(ks[5], (Cf,)),
        g1=1.0 + nrm(ks[6], (Cf,)), bet1=nrm(ks[7], (Cf,)),
        w2=nrm(ks[8], (Cf, Cf, K)), b2=nrm(ks[9], (Cf,)),
        g2=1.0 + nrm(ks[10], (Cf,)), bet2=nrm(ks[11], (Cf,)),
        wp=nrm(ks[12], (1, Cf)), bp=nrm(ks[13], (1,)),
    )

    x = jax.random.normal(ks[14], (B, Cin, T), dtype=jnp.float32)
    z = jax.random.normal(ks[15], (B, Cin, T), dtype=jnp.float32)   # torch.randn_like(x)
    lengths = jnp.array([T, 3 * T // 4], dtype=jnp.int32)
    x_mask = (jnp.arange(T)[None, :] < lengths[:, None]).astype(jnp.float32)[:, None, :]

    y = duration_predictor(x, x_mask, z, params, kernel_size=K)
    y = jax.block_until_ready(y)

    assert y.shape == (B, 1, T), y.shape
    assert bool(jnp.all(jnp.isfinite(y)))

    y_ref = duration_predictor_reference(x, x_mask, z, params, kernel_size=K)
    max_err = float(jnp.max(jnp.abs(y - y_ref)))
    # f32 operands everywhere -> much tighter tolerance than the previous bf16 version.
    assert max_err < 2e-2, f"max abs error vs reference: {max_err}"

    print("KERNEL_OK")
</pallas_src>

<mosaic_0001>
module attributes {stable_mosaic.version = 11 : i64} {
  func.func @_dp_kernel(%arg0: i32, %arg1: memref<8x256xf32, #tpu.memory_space<vmem>>, %arg2: memref<8x256xf32, #tpu.memory_space<vmem>>, %arg3: memref<1x256xf32, #tpu.memory_space<vmem>>, %arg4: memref<8x8xf32, #tpu.memory_space<vmem>>, %arg5: memref<3x32x8xf32, #tpu.memory_space<vmem>>, %arg6: memref<3x32x32xf32, #tpu.memory_space<vmem>>, %arg7: memref<8x3xf32, #tpu.memory_space<vmem>>, %arg8: memref<32x8xf32, #tpu.memory_space<vmem>>, %arg9: memref<1x256xf32, #tpu.memory_space<vmem>>) attributes {dimension_semantics = [#tpu.dimension_semantics<arbitrary>], iteration_bounds = array<i64: 1>, scalar_prefetch = 0 : i64, scratch_operands = 0 : i64, tpu.core_type = #tpu.core_type<tc>, window_params = [{pipeline_mode = #tpu.pipeline_mode<synchronous>, transform_indices = @transform_0, window_bounds = array<i64: 8, 256>}, {pipeline_mode = #tpu.pipeline_mode<synchronous>, transform_indices = @transform_1, window_bounds = array<i64: 8, 256>}, {pipeline_mode = #tpu.pipeline_mode<synchronous>, transform_indices = @transform_2, window_bounds = array<i64: 1, 256>}, {pipeline_mode = #tpu.pipeline_mode<synchronous>, transform_indices = @transform_3, window_bounds = array<i64: 8, 8>}, {pipeline_mode = #tpu.pipeline_mode<synchronous>, transform_indices = @transform_4, window_bounds = array<i64: 3, 32, 8>}, {pipeline_mode = #tpu.pipeline_mode<synchronous>, transform_indices = @transform_5, window_bounds = array<i64: 3, 32, 32>}, {pipeline_mode = #tpu.pipeline_mode<synchronous>, transform_indices = @transform_6, window_bounds = array<i64: 8, 3>}, {pipeline_mode = #tpu.pipeline_mode<synchronous>, transform_indices = @transform_7, window_bounds = array<i64: 32, 8>}, {pipeline_mode = #tpu.pipeline_mode<synchronous>, transform_indices = @transform_8, window_bounds = array<i64: 1, 256>}]} {
    %c0 = arith.constant 0 : index
    %c0_0 = arith.constant 0 : index
    %0 = vector.load %arg1[%c0, %c0_0] : memref<8x256xf32, #tpu.memory_space<vmem>>, vector<8x256xf32>
    %c0_1 = arith.constant 0 : index
    %c0_2 = arith.constant 0 : index
    %1 = vector.load %arg2[%c0_1, %c0_2] : memref<8x256xf32, #tpu.memory_space<vmem>>, vector<8x256xf32>
    %c0_3 = arith.constant 0 : index
    %c0_4 = arith.constant 0 : index
    %2 = vector.load %arg3[%c0_3, %c0_4] : memref<1x256xf32, #tpu.memory_space<vmem>>, vector<1x256xf32>
    %3 = tpu.iota {dimensions = array<i32: 1>} : vector<1x256xi32>
    %c128_i32 = arith.constant 128 : i32
    %c0_i32 = arith.constant 0 : i32
    %4 = arith.cmpi eq, %c128_i32, %c0_i32 : i32
    %c1_i32 = arith.constant 1 : i32
    %5 = arith.select %4, %c1_i32, %c128_i32 : i32
    %6 = vector.broadcast %5 : i32 to vector<1x256xi32>
    %7 = arith.remsi %3, %6 : vector<1x256xi32>
    %c0_i32_5 = arith.constant 0 : i32
    %8 = vector.broadcast %c0_i32_5 : i32 to vector<1x256xi32>
    %9 = arith.cmpi ne, %7, %8 : vector<1x256xi32>
    %c0_i32_6 = arith.constant 0 : i32
    %10 = vector.broadcast %c0_i32_6 : i32 to vector<1x256xi32>
    %11 = arith.cmpi slt, %7, %10 : vector<1x256xi32>
    %c0_i32_7 = arith.constant 0 : i32
    %12 = arith.cmpi slt, %5, %c0_i32_7 : i32
    %13 = vector.broadcast %12 : i1 to vector<1x256xi1>
    %14 = vector.broadcast %13 : vector<1x256xi1> to vector<1x256xi1>
    %15 = arith.xori %11, %14 : vector<1x256xi1>
    %16 = arith.andi %15, %9 : vector<1x256xi1>
    %17 = vector.broadcast %5 : i32 to vector<1x256xi32>
    %18 = arith.addi %7, %17 : vector<1x256xi32>
    %19 = arith.select %16, %18, %7 : vector<1x256xi1>, vector<1x256xi32>
    %c0_8 = arith.constant 0 : index
    %c0_9 = arith.constant 0 : index
    %20 = vector.load %arg4[%c0_8, %c0_9] : memref<8x8xf32, #tpu.memory_space<vmem>>, vector<8x8xf32>
    %cst = arith.constant dense<0.000000e+00> : vector<8x256xf32>
    %21 = tpu.matmul %20, %1, %cst {dimension_numbers = #tpu.dot_dimension_numbers<[1], [0], [0], [1], [0, 0, 1, 1], [], []>} : vector<8x8xf32>, vector<8x256xf32>, vector<8x256xf32> -> vector<8x256xf32>
    %c0_10 = arith.constant 0 : index
    %c0_11 = arith.constant 0 : index
    %22 = vector.load %arg7[%c0_10, %c0_11] : memref<8x3xf32, #tpu.memory_space<vmem>>, vector<8x1xf32>
    %23 = vector.broadcast %22 : vector<8x1xf32> to vector<8x256xf32>
    %24 = arith.addf %21, %23 : vector<8x256xf32>
    %c0_12 = arith.constant 0 : index
    %c1 = arith.constant 1 : index
    %25 = vector.load %arg7[%c0_12, %c1] : memref<8x3xf32, #tpu.memory_space<vmem>>, vector<8x1xf32>
    %c0_13 = arith.constant 0 : index
    %c2 = arith.constant 2 : index
    %26 = vector.load %arg7[%c0_13, %c2] : memref<8x3xf32, #tpu.memory_space<vmem>>, vector<8x1xf32>
    %cst_14 = arith.constant dense<0.000000e+00> : vector<256xf32>
    %27 = vector.multi_reduction <add>, %24, %cst_14 [0] : vector<8x256xf32> to vector<256xf32>
    %28 = vector.shape_cast %27 : vector<256xf32> to vector<1x256xf32>
    %cst_15 = arith.constant 8.000000e+00 : f32
    %29 = vector.broadcast %cst_15 : f32 to vector<1x256xf32>
    %30 = arith.divf %28, %29 : vector<1x256xf32>
    %31 = vector.broadcast %30 : vector<1x256xf32> to vector<8x256xf32>
    %32 = arith.subf %24, %31 : vector<8x256xf32>
    %33 = arith.mulf %32, %32 : vector<8x256xf32>
    %cst_16 = arith.constant dense<0.000000e+00> : vector<256xf32>
    %34 = vector.multi_reduction <add>, %33, %cst_16 [0] : vector<8x256xf32> to vector<256xf32>
    %35 = vector.shape_cast %34 : vector<256xf32> to vector<1x256xf32>
    %cst_17 = arith.constant 8.000000e+00 : f32
    %36 = vector.broadcast %cst_17 : f32 to vector<1x256xf32>
    %37 = arith.divf %35, %36 : vector<1x256xf32>
    %38 = vector.broadcast %30 : vector<1x256xf32> to vector<8x256xf32>
    %39 = arith.subf %24, %38 : vector<8x256xf32>
    %cst_18 = arith.constant 9.99999974E-6 : f32
    %40 = vector.broadcast %cst_18 : f32 to vector<1x256xf32>
    %41 = arith.addf %37, %40 : vector<1x256xf32>
    %42 = math.rsqrt %41 : vector<1x256xf32>
    %43 = vector.broadcast %42 : vector<1x256xf32> to vector<8x256xf32>
    %44 = arith.mulf %39, %43 : vector<8x256xf32>
    %45 = vector.broadcast %25 : vector<8x1xf32> to vector<8x256xf32>
    %46 = arith.mulf %44, %45 : vector<8x256xf32>
    %47 = vector.broadcast %26 : vector<8x1xf32> to vector<8x256xf32>
    %48 = arith.addf %46, %47 : vector<8x256xf32>
    %49 = arith.addf %0, %48 : vector<8x256xf32>
    %50 = vector.broadcast %2 : vector<1x256xf32> to vector<8x256xf32>
    %51 = arith.mulf %49, %50 : vector<8x256xf32>
    %c0_19 = arith.constant 0 : index
    %c0_20 = arith.constant 0 : index
    %52 = vector.load %arg8[%c0_19, %c0_20] : memref<32x8xf32, #tpu.memory_space<vmem>>, vector<32x1xf32>
    %c1_i32_21 = arith.constant 1 : i32
    %53 = tpu.dynamic_rotate %51 by %c1_i32_21 dim 1 : vector<8x256xf32>, i32 -> vector<8x256xf32>
    %c1_i32_22 = arith.constant 1 : i32
    %54 = vector.broadcast %c1_i32_22 : i32 to vector<1x256xi32>
    %55 = arith.cmpi sge, %19, %54 : vector<1x256xi32>
    %cst_23 = arith.constant 0.000000e+00 : f32
    %56 = vector.shape_cast %55 : vector<1x256xi1> to vector<1x256xi1>
    %57 = vector.broadcast %56 : vector<1x256xi1> to vector<8x256xi1>
    %58 = vector.broadcast %cst_23 : f32 to vector<8x256xf32>
    %59 = arith.select %57, %53, %58 : vector<8x256xi1>, vector<8x256xf32>
    %c0_24 = arith.constant 0 : index
    %c0_25 = arith.constant 0 : index
    %c0_26 = arith.constant 0 : index
    %60 = vector.load %arg5[%c0_24, %c0_25, %c0_26] : memref<3x32x8xf32, #tpu.memory_space<vmem>>, vector<1x32x8xf32>
    %61 = vector.shape_cast %60 : vector<1x32x8xf32> to vector<32x8xf32>
    %cst_27 = arith.constant dense<0.000000e+00> : vector<32x256xf32>
    %62 = tpu.matmul %61, %59, %cst_27 {dimension_numbers = #tpu.dot_dimension_numbers<[1], [0], [0], [1], [0, 0, 1, 1], [], []>} : vector<32x8xf32>, vector<8x256xf32>, vector<32x256xf32> -> vector<32x256xf32>
    %c1_28 = arith.constant 1 : index
    %c0_29 = arith.constant 0 : index
    %c0_30 = arith.constant 0 : index
    %63 = vector.load %arg5[%c1_28, %c0_29, %c0_30] : memref<3x32x8xf32, #tpu.memory_space<vmem>>, vector<1x32x8xf32>
    %64 = vector.shape_cast %63 : vector<1x32x8xf32> to vector<32x8xf32>
    %cst_31 = arith.constant dense<0.000000e+00> : vector<32x256xf32>
    %65 = tpu.matmul %64, %51, %cst_31 {dimension_numbers = #tpu.dot_dimension_numbers<[1], [0], [0], [1], [0, 0, 1, 1], [], []>} : vector<32x8xf32>, vector<8x256xf32>, vector<32x256xf32> -> vector<32x256xf32>
    %66 = arith.addf %62, %65 : vector<32x256xf32>
    %c255_i32 = arith.constant 255 : i32
    %67 = tpu.dynamic_rotate %51 by %c255_i32 dim 1 : vector<8x256xf32>, i32 -> vector<8x256xf32>
    %c127_i32 = arith.constant 127 : i32
    %68 = vector.broadcast %c127_i32 : i32 to vector<1x256xi32>
    %69 = arith.cmpi slt, %19, %68 : vector<1x256xi32>
    %cst_32 = arith.constant 0.000000e+00 : f32
    %70 = vector.shape_cast %69 : vector<1x256xi1> to vector<1x256xi1>
    %71 = vector.broadcast %70 : vector<1x256xi1> to vector<8x256xi1>
    %72 = vector.broadcast %cst_32 : f32 to vector<8x256xf32>
    %73 = arith.select %71, %67, %72 : vector<8x256xi1>, vector<8x256xf32>
    %c2_33 = arith.constant 2 : index
    %c0_34 = arith.constant 0 : index
    %c0_35 = arith.constant 0 : index
    %74 = vector.load %arg5[%c2_33, %c0_34, %c0_35] : memref<3x32x8xf32, #tpu.memory_space<vmem>>, vector<1x32x8xf32>
    %75 = vector.shape_cast %74 : vector<1x32x8xf32> to vector<32x8xf32>
    %cst_36 = arith.constant dense<0.000000e+00> : vector<32x256xf32>
    %76 = tpu.matmul %75, %73, %cst_36 {dimension_numbers = #tpu.dot_dimension_numbers<[1], [0], [0], [1], [0, 0, 1, 1], [], []>} : vector<32x8xf32>, vector<8x256xf32>, vector<32x256xf32> -> vector<32x256xf32>
    %77 = arith.addf %66, %76 : vector<32x256xf32>
    %78 = vector.broadcast %52 : vector<32x1xf32> to vector<32x256xf32>
    %79 = arith.addf %77, %78 : vector<32x256xf32>
    %cst_37 = arith.constant 0.000000e+00 : f32
    %80 = vector.broadcast %cst_37 : f32 to vector<32x256xf32>
    %81 = arith.maximumf %79, %80 : vector<32x256xf32>
    %c0_38 = arith.constant 0 : index
    %c1_39 = arith.constant 1 : index
    %82 = vector.load %arg8[%c0_38, %c1_39] : memref<32x8xf32, #tpu.memory_space<vmem>>, vector<32x1xf32>
    %c0_40 = arith.constant 0 : index
    %c2_41 = arith.constant 2 : index
    %83 = vector.load %arg8[%c0_40, %c2_41] : memref<32x8xf32, #tpu.memory_space<vmem>>, vector<32x1xf32>
    %cst_42 = arith.constant dense<0.000000e+00> : vector<256xf32>
    %84 = vector.multi_reduction <add>, %81, %cst_42 [0] : vector<32x256xf32> to vector<256xf32>
    %85 = vector.shape_cast %84 : vector<256xf32> to vector<1x256xf32>
    %cst_43 = arith.constant 3.200000e+01 : f32
    %86 = vector.broadcast %cst_43 : f32 to vector<1x256xf32>
    %87 = arith.divf %85, %86 : vector<1x256xf32>
    %88 = vector.broadcast %87 : vector<1x256xf32> to vector<32x256xf32>
    %89 = arith.subf %81, %88 : vector<32x256xf32>
    %90 = arith.mulf %89, %89 : vector<32x256xf32>
    %cst_44 = arith.constant dense<0.000000e+00> : vector<256xf32>
    %91 = vector.multi_reduction <add>, %90, %cst_44 [0] : vector<32x256xf32> to vector<256xf32>
    %92 = vector.shape_cast %91 : vector<256xf32> to vector<1x256xf32>
    %cst_45 = arith.constant 3.200000e+01 : f32
    %93 = vector.broadcast %cst_45 : f32 to vector<1x256xf32>
    %94 = arith.divf %92, %93 : vector<1x256xf32>
    %95 = vector.broadcast %87 : vector<1x256xf32> to vector<32x256xf32>
    %96 = arith.subf %81, %95 : vector<32x256xf32>
    %cst_46 = arith.constant 9.99999974E-6 : f32
    %97 = vector.broadcast %cst_46 : f32 to vector<1x256xf32>
    %98 = arith.addf %94, %97 : vector<1x256xf32>
    %99 = math.rsqrt %98 : vector<1x256xf32>
    %100 = vector.broadcast %99 : vector<1x256xf32> to vector<32x256xf32>
    %101 = arith.mulf %96, %100 : vector<32x256xf32>
    %102 = vector.broadcast %82 : vector<32x1xf32> to vector<32x256xf32>
    %103 = arith.mulf %101, %102 : vector<32x256xf32>
    %104 = vector.broadcast %83 : vector<32x1xf32> to vector<32x256xf32>
    %105 = arith.addf %103, %104 : vector<32x256xf32>
    %106 = vector.broadcast %2 : vector<1x256xf32> to vector<32x256xf32>
    %107 = arith.mulf %105, %106 : vector<32x256xf32>
    %c0_47 = arith.constant 0 : index
    %c3 = arith.constant 3 : index
    %108 = vector.load %arg8[%c0_47, %c3] : memref<32x8xf32, #tpu.memory_space<vmem>>, vector<32x1xf32>
    %c1_i32_48 = arith.constant 1 : i32
    %109 = tpu.dynamic_rotate %107 by %c1_i32_48 dim 1 : vector<32x256xf32>, i32 -> vector<32x256xf32>
    %c1_i32_49 = arith.constant 1 : i32
    %110 = vector.broadcast %c1_i32_49 : i32 to vector<1x256xi32>
    %111 = arith.cmpi sge, %19, %110 : vector<1x256xi32>
    %cst_50 = arith.constant 0.000000e+00 : f32
    %112 = vector.shape_cast %111 : vector<1x256xi1> to vector<1x256xi1>
    %113 = vector.broadcast %112 : vector<1x256xi1> to vector<32x256xi1>
    %114 = vector.broadcast %cst_50 : f32 to vector<32x256xf32>
    %115 = arith.select %113, %109, %114 : vector<32x256xi1>, vector<32x256xf32>
    %c0_51 = arith.constant 0 : index
    %c0_52 = arith.constant 0 : index
    %c0_53 = arith.constant 0 : index
    %116 = vector.load %arg6[%c0_51, %c0_52, %c0_53] : memref<3x32x32xf32, #tpu.memory_space<vmem>>, vector<1x32x32xf32>
    %117 = vector.shape_cast %116 : vector<1x32x32xf32> to vector<32x32xf32>
    %cst_54 = arith.constant dense<0.000000e+00> : vector<32x256xf32>
    %118 = tpu.matmul %117, %115, %cst_54 {dimension_numbers = #tpu.dot_dimension_numbers<[1], [0], [0], [1], [0, 0, 1, 1], [], []>} : vector<32x32xf32>, vector<32x256xf32>, vector<32x256xf32> -> vector<32x256xf32>
    %c1_55 = arith.constant 1 : index
    %c0_56 = arith.constant 0 : index
    %c0_57 = arith.constant 0 : index
    %119 = vector.load %arg6[%c1_55, %c0_56, %c0_57] : memref<3x32x32xf32, #tpu.memory_space<vmem>>, vector<1x32x32xf32>
    %120 = vector.shape_cast %119 : vector<1x32x32xf32> to vector<32x32xf32>
    %cst_58 = arith.constant dense<0.000000e+00> : vector<32x256xf32>
    %121 = tpu.matmul %120, %107, %cst_58 {dimension_numbers = #tpu.dot_dimension_numbers<[1], [0], [0], [1], [0, 0, 1, 1], [], []>} : vector<32x32xf32>, vector<32x256xf32>, vector<32x256xf32> -> vector<32x256xf32>
    %122 = arith.addf %118, %121 : vector<32x256xf32>
    %c255_i32_59 = arith.constant 255 : i32
    %123 = tpu.dynamic_rotate %107 by %c255_i32_59 dim 1 : vector<32x256xf32>, i32 -> vector<32x256xf32>
    %c127_i32_60 = arith.constant 127 : i32
    %124 = vector.broadcast %c127_i32_60 : i32 to vector<1x256xi32>
    %125 = arith.cmpi slt, %19, %124 : vector<1x256xi32>
    %cst_61 = arith.constant 0.000000e+00 : f32
    %126 = vector.shape_cast %125 : vector<1x256xi1> to vector<1x256xi1>
    %127 = vector.broadcast %126 : vector<1x256xi1> to vector<32x256xi1>
    %128 = vector.broadcast %cst_61 : f32 to vector<32x256xf32>
    %129 = arith.select %127, %123, %128 : vector<32x256xi1>, vector<32x256xf32>
    %c2_62 = arith.constant 2 : index
    %c0_63 = arith.constant 0 : index
    %c0_64 = arith.constant 0 : index
    %130 = vector.load %arg6[%c2_62, %c0_63, %c0_64] : memref<3x32x32xf32, #tpu.memory_space<vmem>>, vector<1x32x32xf32>
    %131 = vector.shape_cast %130 : vector<1x32x32xf32> to vector<32x32xf32>
    %cst_65 = arith.constant dense<0.000000e+00> : vector<32x256xf32>
    %132 = tpu.matmul %131, %129, %cst_65 {dimension_numbers = #tpu.dot_dimension_numbers<[1], [0], [0], [1], [0, 0, 1, 1], [], []>} : vector<32x32xf32>, vector<32x256xf32>, vector<32x256xf32> -> vector<32x256xf32>
    %133 = arith.addf %122, %132 : vector<32x256xf32>
    %134 = vector.broadcast %108 : vector<32x1xf32> to vector<32x256xf32>
    %135 = arith.addf %133, %134 : vector<32x256xf32>
    %cst_66 = arith.constant 0.000000e+00 : f32
    %136 = vector.broadcast %cst_66 : f32 to vector<32x256xf32>
    %137 = arith.maximumf %135, %136 : vector<32x256xf32>
    %c0_67 = arith.constant 0 : index
    %c4 = arith.constant 4 : index
    %138 = vector.load %arg8[%c0_67, %c4] : memref<32x8xf32, #tpu.memory_space<vmem>>, vector<32x1xf32>
    %c0_68 = arith.constant 0 : index
    %c5 = arith.constant 5 : index
    %139 = vector.load %arg8[%c0_68, %c5] : memref<32x8xf32, #tpu.memory_space<vmem>>, vector<32x1xf32>
    %cst_69 = arith.constant dense<0.000000e+00> : vector<256xf32>
    %140 = vector.multi_reduction <add>, %137, %cst_69 [0] : vector<32x256xf32> to vector<256xf32>
    %141 = vector.shape_cast %140 : vector<256xf32> to vector<1x256xf32>
    %cst_70 = arith.constant 3.200000e+01 : f32
    %142 = vector.broadcast %cst_70 : f32 to vector<1x256xf32>
    %143 = arith.divf %141, %142 : vector<1x256xf32>
    %144 = vector.broadcast %143 : vector<1x256xf32> to vector<32x256xf32>
    %145 = arith.subf %137, %144 : vector<32x256xf32>
    %146 = arith.mulf %145, %145 : vector<32x256xf32>
    %cst_71 = arith.constant dense<0.000000e+00> : vector<256xf32>
    %147 = vector.multi_reduction <add>, %146, %cst_71 [0] : vector<32x256xf32> to vector<256xf32>
    %148 = vector.shape_cast %147 : vector<256xf32> to vector<1x256xf32>
    %cst_72 = arith.constant 3.200000e+01 : f32
    %149 = vector.broadcast %cst_72 : f32 to vector<1x256xf32>
    %150 = arith.divf %148, %149 : vector<1x256xf32>
    %151 = vector.broadcast %143 : vector<1x256xf32> to vector<32x256xf32>
    %152 = arith.subf %137, %151 : vector<32x256xf32>
    %cst_73 = arith.constant 9.99999974E-6 : f32
    %153 = vector.broadcast %cst_73 : f32 to vector<1x256xf32>
    %154 = arith.addf %150, %153 : vector<1x256xf32>
    %155 = math.rsqrt %154 : vector<1x256xf32>
    %156 = vector.broadcast %155 : vector<1x256xf32> to vector<32x256xf32>
    %157 = arith.mulf %152, %156 : vector<32x256xf32>
    %158 = vector.broadcast %138 : vector<32x1xf32> to vector<32x256xf32>
    %159 = arith.mulf %157, %158 : vector<32x256xf32>
    %160 = vector.broadcast %139 : vector<32x1xf32> to vector<32x256xf32>
    %161 = arith.addf %159, %160 : vector<32x256xf32>
    %c0_74 = arith.constant 0 : index
    %c6 = arith.constant 6 : index
    %162 = vector.load %arg8[%c0_74, %c6] : memref<32x8xf32, #tpu.memory_space<vmem>>, vector<32x1xf32>
    %163 = vector.broadcast %162 : vector<32x1xf32> to vector<32x256xf32>
    %164 = arith.mulf %161, %163 : vector<32x256xf32>
    %cst_75 = arith.constant dense<0.000000e+00> : vector<256xf32>
    %165 = vector.multi_reduction <add>, %164, %cst_75 [0] : vector<32x256xf32> to vector<256xf32>
    %166 = vector.shape_cast %165 : vector<256xf32> to vector<1x256xf32>
    %c0_76 = arith.constant 0 : index
    %c7 = arith.constant 7 : index
    %167 = vector.load %arg8[%c0_76, %c7] : memref<32x8xf32, #tpu.memory_space<vmem>>, vector<1x1xf32>
    %168 = vector.broadcast %167 : vector<1x1xf32> to vector<1x256xf32>
    %169 = arith.addf %166, %168 : vector<1x256xf32>
    %170 = arith.mulf %169, %2 : vector<1x256xf32>
    %c0_77 = arith.constant 0 : index
    %c0_78 = arith.constant 0 : index
    %171 = vector.load %arg9[%c0_77, %c0_78] : memref<1x256xf32, #tpu.memory_space<vmem>>, vector<1x256xf32>
    tpu.vector_store %arg9[%c0_77, %c0_78], %170 {strides = array<i32>} : memref<1x256xf32, #tpu.memory_space<vmem>>, vector<1x256xf32>,
    return
  }
  func.func @transform_0(%arg0: i32) -> (i32, i32) {
    %c0_i32 = arith.constant 0 : i32
    %c0_i32_0 = arith.constant 0 : i32
    %c0_i32_1 = arith.constant 0 : i32
    return %c0_i32, %c0_i32_0 : i32, i32
  }
  func.func @transform_1(%arg0: i32) -> (i32, i32) {
    %c0_i32 = arith.constant 0 : i32
    %c0_i32_0 = arith.constant 0 : i32
    %c0_i32_1 = arith.constant 0 : i32
    return %c0_i32, %c0_i32_0 : i32, i32
  }
  func.func @transform_2(%arg0: i32) -> (i32, i32) {
    %c0_i32 = arith.constant 0 : i32
    %c0_i32_0 = arith.constant 0 : i32
    %c0_i32_1 = arith.constant 0 : i32
    return %c0_i32, %c0_i32_0 : i32, i32
  }
  func.func @transform_3(%arg0: i32) -> (i32, i32) {
    %c0_i32 = arith.constant 0 : i32
    %c0_i32_0 = arith.constant 0 : i32
    %c0_i32_1 = arith.constant 0 : i32
    return %c0_i32, %c0_i32_0 : i32, i32
  }
  func.func @transform_4(%arg0: i32) -> (i32, i32, i32) {
    %c0_i32 = arith.constant 0 : i32
    %c0_i32_0 = arith.constant 0 : i32
    %c0_i32_1 = arith.constant 0 : i32
    %c0_i32_2 = arith.constant 0 : i32
    return %c0_i32, %c0_i32_0, %c0_i32_1 : i32, i32, i32
  }
  func.func @transform_5(%arg0: i32) -> (i32, i32, i32) {
    %c0_i32 = arith.constant 0 : i32
    %c0_i32_0 = arith.constant 0 : i32
    %c0_i32_1 = arith.constant 0 : i32
    %c0_i32_2 = arith.constant 0 : i32
    return %c0_i32, %c0_i32_0, %c0_i32_1 : i32, i32, i32
  }
  func.func @transform_6(%arg0: i32) -> (i32, i32) {
    %c0_i32 = arith.constant 0 : i32
    %c0_i32_0 = arith.constant 0 : i32
    %c0_i32_1 = arith.constant 0 : i32
    return %c0_i32, %c0_i32_0 : i32, i32
  }
  func.func @transform_7(%arg0: i32) -> (i32, i32) {
    %c0_i32 = arith.constant 0 : i32
    %c0_i32_0 = arith.constant 0 : i32
    %c0_i32_1 = arith.constant 0 : i32
    return %c0_i32, %c0_i32_0 : i32, i32
  }
  func.func @transform_8(%arg0: i32) -> (i32, i32) {
    %c0_i32 = arith.constant 0 : i32
    %c0_i32_0 = arith.constant 0 : i32
    %c0_i32_1 = arith.constant 0 : i32
    return %c0_i32, %c0_i32_0 : i32, i32
  }
}

</mosaic_0001>

<bundles_post_ra>
// kernel: tpu_custom_call.1
= control target key start
LH: loop header
LB: loop body
LE: loop exit
PB: predicated region body
PF: predicated region fallthrough
CT: control target
= control target key end

     0   :  { %vm69_vm0 = vcmask 64512   ;;  %s1822_s0 = inlined_call_operand.vmem [shape: f32[8,256], index: 0, kind: input, shape index: {}]   ;;  %s1823_s1 = inlined_call_operand.vmem [shape: f32[8,256], index: 1, kind: input, shape index: {}]   ;;  %s1824_s2 = inlined_call_operand.vmem [shape: f32[1,256], index: 2, kind: input, shape index: {}]   ;;  %s1825_s3 = inlined_call_operand.vmem [shape: f32[8,8], index: 3, kind: input, shape index: {}]   ;;  %s1826_s4 = inlined_call_operand.vmem [shape: f32[3,32,8], index: 4, kind: input, shape index: {}]   ;;  %s1827_s5 = inlined_call_operand.vmem [shape: f32[3,32,32], index: 5, kind: input, shape index: {}]   ;;  %s1828_s6 = inlined_call_operand.vmem [shape: f32[8,3], index: 6, kind: input, shape index: {}]   ;;  %s1829_s7 = inlined_call_operand.vmem [shape: f32[32,8], index: 7, kind: input, shape index: {}]   ;;  %s1830_s8 = inlined_call_operand.hbm [shape: f32[1,256], index: 8, kind: output, shape index: {}]  }
   0x1   :  { %v32_v0 = vld [vmem:[%s1823_s1] sm:$0xff]  ;;  %v33_v1 = vld [vmem:[%s1823_s1 + $0x8] sm:$0xff] }
   0x2   :  { %v62_v2 = vld [vmem:[%s1825_s3] sm:$0xff]  ;;  %88 = vmatpush.msra.mxu0 %v32_v0  ;;  %108 = vmatpush.msra.mxu1 %v33_v1 }
   0x3   :  { %v63_v3 = vld [vmem:[%s1828_s6] sm:$0xff] }
   0x4   :  { %13 = vsyncpa [#allocation3], 0  ;;  %1190 = vmatmul.msk.f32.vlgmr.msra.gmra.mxu0 %vm69_vm0, %v62_v2  ;;  %1191 = vmatmul.msk.f32.vlgmr.msra.gmra.mxu1 %vm69_vm0, %v62_v2  ;;  %v1354_v4 = vmov 0   ;;  %v1355_v5 = vmov 2   ;;  %v1356_v6 = vmov 1   ;;  %v1357_v7 = vmov 8.0  }
   0x5   :  { %1289 = vset.pattern.permute.xlu0 %v1354_v4  ;;  %1291 = vset.pattern.permute.xlu1 %v1355_v5  ;;  %1312 = vrcp.f32 %v1357_v7  ;;  %s1358_s17 = smov 127  }
   0x6   :  { %66 = vperm.xlu0 %1289, %v63_v3   ;;  %183 = vperm.xlu1 %1291, %v63_v3  }
   0x7   :  { %1292 = vset.pattern.permute.xlu2 %v1354_v4 }
   0xb   :  { %v1313_v8 = vpop.eup %1312 }
   0xc   :  { %v126_v9 = vmul.f32 8.0, %v1313_v8  ;;  %vm130_vm1 = vweird.f32 %v1313_v8 }
   0xe   :  { %1290 = vset.pattern.permute.xlu0 %v1356_v6  ;;  %1294 = vset.pattern.permute.xlu1 %v1354_v4  ;;  %v127_v12 = vsub.f32 1.0, %v126_v9  ;;  %v34_v9 = vld [vmem:[%s1824_s2] sm:$0x3] }
   0xf   :  { %177 = vperm.xlu0 %1290, %v63_v3  }
  0x10   :  { %v128_v18 = vmul.f32 %v1313_v8, %v127_v12  ;;  %v30_v12 = vld [vmem:[%s1822_s0] sm:$0xff] }
  0x12   :  { %v129_v23 = vadd.f32 %v1313_v8, %v128_v18 }
  0x14   :  { %v131_v28 = vsel %vm130_vm1, %v1313_v8, %v129_v23  ;;  %v1193_v23 = vld [vmem:[%s1826_s4 + $0x28] sm:$0xff] }
  0x17   :  { %1293 = vset.pattern.permute.xlu0 %v1354_v4 }
  0x78   :  { %v67_v10 = vpop.permute.xlu0 %66  ;;  %v184_v8 = vpop.permute.xlu1 %183 }
  0x81   :  { %v90_v11 = vpop.f32.mrf.mxu0  ;;  %v110_v13 = vpop.f32.mrf.mxu1 }
  0x82   :  { %v91_v14 = vadd.f32 %v90_v11, %v67_v10  ;;  %v111_v15 = vadd.f32 %v110_v13, %v67_v10  ;;  %v178_v1 = vpop.permute.xlu0 %177  ;;  %v31_v13 = vld [vmem:[%s1822_s0 + $0x8] sm:$0xff]  ;;  %s1359_s0 = smov 1  }
  0x84   :  { %v113_v16 = vrot.slane %v91_v14, 4  ;;  %v119_v17 = vrot.slane %v111_v15, 4 }
  0x86   :  { %v114_v19 = vadd.f32 %v113_v16, %v91_v14  ;;  %v120_v20 = vadd.f32 %v119_v17, %v111_v15  ;;  %v1439_v17 = vperm.slane %v34_v9, 1 }
  0x88   :  { %v115_v21 = vrot.slane %v114_v19, 2  ;;  %v121_v22 = vrot.slane %v120_v20, 2 }
  0x8a   :  { %v116_v24 = vadd.f32 %v115_v21, %v114_v19  ;;  %v122_v25 = vadd.f32 %v121_v22, %v120_v20  ;;  %v1192_v22 = vld [vmem:[%s1826_s4 + $0x20] sm:$0xff] }
  0x8c   :  { %v117_v26 = vrot.slane %v116_v24, 1  ;;  %v123_v27 = vrot.slane %v122_v25, 1 }
  0x8e   :  { %v118_v29 = vadd.f32 %v117_v26, %v116_v24  ;;  %v124_v30 = vadd.f32 %v123_v27, %v122_v25  ;;  %v1194_v24 = vld [vmem:[%s1826_s4 + $0x30] sm:$0xff]  ;;  %v1195_v25 = vld [vmem:[%s1826_s4 + $0x38] sm:$0xff]  ;;  %v35_v26 = vlaneseq }
  0x90   :  { %v132_v31 = vmul.f32 %v131_v28, %v118_v29  ;;  %v133_v32 = vmul.f32 %v131_v28, %v124_v30  ;;  %v1468_v27 = vand.u32 127, %v35_v26  ;;  %v1474_v30 = vld [vmem:[%s1829_s7 + $0x8] sm:$0xff] }
  0x91   :  { %470 = vperm.xlu0 %1293, %v1474_v30  }
  0x92   :  { %v134_v33 = vsub.f32 %v91_v14, %v132_v31  ;;  %v135_v34 = vsub.f32 %v111_v15, %v133_v32  ;;  %v1437_v15 = vperm.slane %v34_v9, 0  ;;  %vm369_vm8 = vcmp.lt.s32.totalorder %v1468_v27, 127  ;;  %v1259_v32 = vld [vmem:[%s1827_s5 + $0x58] sm:$0xff] }
  0x93   :  { %vm205_vm10 = vcmp.lt.s32.totalorder %v1468_v27, 1  ;;  %vm208_vm11 = vcmp.ge.s32.totalorder %v1468_v27, 1 }
  0x94   :  { %v136_v35 = vmul.f32 %v134_v33, %v134_v33  ;;  %v137_v36 = vmul.f32 %v135_v34, %v135_v34 }
  0x96   :  { %v138_v37 = vrot.slane %v136_v35, 4  ;;  %v144_v38 = vrot.slane %v137_v36, 4 }
  0x98   :  { %v139_v39 = vadd.f32 %v138_v37, %v136_v35  ;;  %v145_v40 = vadd.f32 %v144_v38, %v137_v36  ;;  %v1498_v37 = vld [vmem:[%s1829_s7 + $0x10] sm:$0xff]  ;;  %v1503_v38 = vld [vmem:[%s1829_s7] sm:$0xff] }
  0x99   :  { %1297 = vset.pattern.permute.xlu0 %v1355_v5 }
  0x9a   :  { %v140_v41 = vrot.slane %v139_v39, 2  ;;  %v146_v42 = vrot.slane %v145_v40, 2 }
  0x9c   :  { %v141_v43 = vadd.f32 %v140_v41, %v139_v39  ;;  %v147_v44 = vadd.f32 %v146_v42, %v145_v40  ;;  %v1510_v39 = vld [vmem:[%s1829_s7 + $0x18] sm:$0xff] }
  0x9d   :  { %629 = vperm.xlu0 %1297, %v1510_v39  }
  0x9e   :  { %v142_v45 = vrot.slane %v141_v43, 1  ;;  %v148_v46 = vrot.slane %v147_v44, 1 }
  0xa0   :  { %v143_v47 = vadd.f32 %v142_v45, %v141_v43  ;;  %v149_v48 = vadd.f32 %v148_v46, %v147_v44  ;;  %v216_v43 = vld [vmem:[%s1826_s4] sm:$0xff]  ;;  %v1215_v46 = vld [vmem:[%s1826_s4 + $0x48] sm:$0xff] }
  0xa2   :  { %v150_v49 = vmul.f32 %v143_v47, %v131_v28  ;;  %v151_v50 = vmul.f32 %v149_v48, %v131_v28  ;;  %v37_v28 = vadd.s32 128, %v1468_v27  ;;  %v217_v47 = vld [vmem:[%s1826_s4 + $0x8] sm:$0xff]  ;;  %v1216_v48 = vld [vmem:[%s1826_s4 + $0x50] sm:$0xff] }
  0xa3   :  { %v1258_v27 = vld [vmem:[%s1827_s5 + $0x50] sm:$0xff] }
  0xa4   :  { %v152_v51 = vadd.f32 1e-05, %v150_v49  ;;  %v153_v52 = vadd.f32 1e-05, %v151_v50  ;;  %v49_v29 = vand.u32 127, %v37_v28  ;;  %v218_v49 = vld [vmem:[%s1826_s4 + $0x10] sm:$0xff] }
  0xa5   :  { %617 = vperm.xlu0 %1297, %v1503_v38   ;;  %v1217_v50 = vld [vmem:[%s1826_s4 + $0x58] sm:$0xff] }
  0xa6   :  { %1314 = vrsqrt.f32 %v152_v51  ;;  %vm160_vm4 = vweird.f32 %v152_v51  ;;  %vm170_vm6 = vweird.f32 %v153_v52  ;;  %vm1478_vm9 = vcmp.lt.s32.totalorder %v49_v29, 127 }
  0xa7   :  { %1316 = vrsqrt.f32 %v153_v52  ;;  %vm1516_vm12 = vcmp.ge.s32.totalorder %v49_v29, 1 }
  0xac   :  { %v1315_v53 = vpop.eup %1314 }
  0xad   :  { %v1317_v54 = vpop.eup %1316  ;;  %v155_v55 = vmul.f32 %v1315_v53, %v152_v51  ;;  %vm161_vm2 = vweird.f32 %v1315_v53 }
  0xae   :  { %v165_v56 = vmul.f32 %v1317_v54, %v153_v52  ;;  %vm171_vm3 = vweird.f32 %v1317_v54  ;;  %vm162_vm5 = vmor %vm160_vm4, %vm161_vm2  ;;  %vm689_vm4 = vcmask 261120  }
  0xaf   :  { %v156_v57 = vmul.f32 %v1315_v53, %v155_v55  ;;  %vm172_vm7 = vmor %vm170_vm6, %vm171_vm3 }
  0xb0   :  { %v166_v58 = vmul.f32 %v1317_v54, %v165_v56 }
  0xb1   :  { %v157_v59 = vmul.f32 0.5, %v156_v57 }
  0xb2   :  { %v167_v60 = vmul.f32 0.5, %v166_v58 }
  0xb3   :  { %v158_v61 = vsub.f32 1.5, %v157_v59 }
  0xb4   :  { %v168_v62 = vsub.f32 1.5, %v167_v60 }
  0xb5   :  { %v159_v63 = vmul.f32 %v1315_v53, %v158_v61 }
  0xb6   :  { %v169_v0 = vmul.f32 %v1317_v54, %v168_v62 }
  0xb7   :  { %v163_v2 = vsel %vm162_vm5, %v1315_v53, %v159_v63 }
  0xb8   :  { %v173_v3 = vsel %vm172_vm7, %v1317_v54, %v169_v0  ;;  %v174_v4 = vmul.f32 %v163_v2, %v134_v33 }
  0xb9   :  { %v175_v7 = vmul.f32 %v173_v3, %v135_v34  ;;  %v1214_v34 = vld [vmem:[%s1826_s4 + $0x40] sm:$0xff] }
  0xba   :  { %v180_v10 = vmul.f32 %v178_v1, %v174_v4 }
  0xbb   :  { %v181_v11 = vmul.f32 %v178_v1, %v175_v7 }
  0xbc   :  { %v186_v14 = vadd.f32 %v184_v8, %v180_v10 }
  0xbd   :  { %v187_v16 = vadd.f32 %v184_v8, %v181_v11 }
  0xbe   :  { %v188_v18 = vadd.f32 %v186_v14, %v30_v12 }
  0xbf   :  { %v189_v19 = vadd.f32 %v187_v16, %v31_v13 }
  0xc0   :  { %v195_v20 = vmul.f32 %v1437_v15, %v188_v18 }
  0xc1   :  { %v196_v21 = vmul.f32 %v1439_v17, %v189_v19 }
  0xc2   :  { %365 = vrot.lane.b32.xlu1 %v195_v20, %s1358_s17  ;;  %252 = vmatpush.msra.mxu2 %v195_v20 }
  0xc3   :  { %367 = vrot.lane.b32.xlu2 %v196_v21, %s1358_s17  ;;  %281 = vmatpush.msra.mxu3 %v196_v21 }
  0xc4   :  { %1196 = vmatmul.msk.f32.vlgmr.msra.gmra.mxu2 %vm69_vm0, %v1192_v22  ;;  %1200 = vmatmul.msk.f32.vlgmr.msra.gmra.mxu3 %vm69_vm0, %v1192_v22 }
  0xca   :  { %203 = vrot.lane.b32.xlu1 %v196_v21, %s1359_s0 }
  0xcb   :  { %201 = vrot.lane.b32.xlu2 %v195_v20, %s1359_s0 }
  0xcc   :  { %1197 = vmatmul.msk.f32.gmra.mxu2 %vm69_vm0, %v1193_v23  ;;  %1201 = vmatmul.msk.f32.gmra.mxu3 %vm69_vm0, %v1193_v23 }
  0xd2   :  { %475 = vperm.xlu1 %1294, %v1498_v37  }
  0xd3   :  { %465 = vperm.xlu2 %1292, %v1503_v38  }
  0xd4   :  { %1198 = vmatmul.msk.f32.gmra.mxu2 %vm69_vm0, %v1194_v24  ;;  %1202 = vmatmul.msk.f32.gmra.mxu3 %vm69_vm0, %v1194_v24  ;;  %v1360_v24 = vmov 32.0  }
  0xd5   :  { %1318 = vrcp.f32 %v1360_v24 }
  0xda   :  { %1295 = vset.pattern.permute.xlu1 %v1356_v6 }
  0xdb   :  { %480 = vperm.xlu2 %1292, %v1510_v39   ;;  %605 = vperm.xlu1 %1295, %v1510_v39  }
  0xdc   :  { %1199 = vmatmul.msk.f32.gmra.mxu2 %vm69_vm0, %v1195_v25  ;;  %1203 = vmatmul.msk.f32.gmra.mxu3 %vm69_vm0, %v1195_v25 }
  0xe3   :  { %1296 = vset.pattern.permute.xlu2 %v1356_v6  ;;  %597 = vperm.xlu1 %1295, %v1474_v30   ;;  %v219_v6 = vld [vmem:[%s1826_s4 + $0x18] sm:$0xff]  ;;  %s1181_s4 = sshll.u32 %s1830_s8, 4  ;;  %s1182_s4 = int_to_ptr.hbm [resolvable:$true] %s1181_s4 }
  0xe4   :  { %601 = vperm.xlu2 %1296, %v1498_v37  }
  0xeb   :  { %593 = vperm.xlu1 %1295, %v1503_v38  }
  0xec   :  { %1298 = vset.pattern.permute.xlu2 %v1355_v5 }
  0xed   :  { %625 = vperm.xlu2 %1298, %v1498_v37  }
  0xf5   :  { %621 = vperm.xlu2 %1298, %v1474_v30  }
 0x103   :  { %v471_v20 = vpop.permute.xlu0 %470 }
 0x11d   :  { %v368_v31 = vpop.permute.xlu2 %367 }
 0x125   :  { %v202_v41 = vpop.permute.xlu2 %201 }
 0x12d   :  { %v466_v21 = vpop.permute.xlu2 %465 }
 0x134   :  { %v366_v33 = vpop.permute.xlu1 %365 }
 0x135   :  { %v370_v35 = vsel %vm369_vm8, %v366_v33, %v368_v31  ;;  %v371_v36 = vsel %vm369_vm8, %v368_v31, %v366_v33 }
 0x136   :  { %1218 = vmatpush.msk.msrb.mxu2 %vm369_vm8, %v370_v35  ;;  %1223 = vmatpush.msk.msrb.mxu3 %vm1478_vm9, %v371_v36 }
 0x137   :  { %1219 = vmatmul.msk.f32.vlgmr.msrb.gmra.mxu2 %vm69_vm0, %v1214_v34  ;;  %1224 = vmatmul.msk.f32.vlgmr.msrb.gmra.mxu3 %vm69_vm0, %v1214_v34 }
 0x13c   :  { %v204_v42 = vpop.permute.xlu1 %203 }
 0x13d   :  { %v207_v44 = vsel %vm205_vm10, %v204_v42, %v202_v41  ;;  %v206_v45 = vsel %vm205_vm10, %v202_v41, %v204_v42 }
 0x13e   :  { %1204 = vmatpush.msk.msrb.mxu0 %vm208_vm11, %v207_v44  ;;  %1209 = vmatpush.msk.msrb.mxu1 %vm1516_vm12, %v206_v45  ;;  %v1319_v44 = vpop.eup %1318 }
 0x13f   :  { %1205 = vmatmul.msk.f32.vlgmr.msrb.gmra.mxu0 %vm69_vm0, %v216_v43  ;;  %1210 = vmatmul.msk.f32.vlgmr.msrb.gmra.mxu1 %vm69_vm0, %v216_v43  ;;  %vm522_vm13 = vweird.f32 %v1319_v44 }
 0x140   :  { %1220 = vmatmul.msk.f32.gmra.mxu2 %vm69_vm0, %v1215_v46  ;;  %1225 = vmatmul.msk.f32.gmra.mxu3 %vm69_vm0, %v1215_v46 }
 0x144   :  { %v476_v25 = vpop.permute.xlu1 %475 }
 0x147   :  { %1206 = vmatmul.msk.f32.gmra.mxu0 %vm69_vm0, %v217_v47  ;;  %1211 = vmatmul.msk.f32.gmra.mxu1 %vm69_vm0, %v217_v47  ;;  %v254_v51 = vpop.f32.mrf.mxu2  ;;  %v283_v52 = vpop.f32.mrf.mxu3 }
 0x148   :  { %1221 = vmatmul.msk.f32.gmra.mxu2 %vm69_vm0, %v1216_v48  ;;  %1226 = vmatmul.msk.f32.gmra.mxu3 %vm69_vm0, %v1216_v48 }
 0x14f   :  { %1207 = vmatmul.msk.f32.gmra.mxu0 %vm69_vm0, %v218_v49  ;;  %1212 = vmatmul.msk.f32.gmra.mxu1 %vm69_vm0, %v218_v49  ;;  %v257_v53 = vpop.f32.mrf.mxu2  ;;  %v286_v54 = vpop.f32.mrf.mxu3 }
 0x150   :  { %1222 = vmatmul.msk.f32.gmra.mxu2 %vm69_vm0, %v1217_v50  ;;  %1227 = vmatmul.msk.f32.gmra.mxu3 %vm69_vm0, %v1217_v50 }
 0x157   :  { %1208 = vmatmul.msk.f32.gmra.mxu0 %vm69_vm0, %v219_v6  ;;  %1213 = vmatmul.msk.f32.gmra.mxu1 %vm69_vm0, %v219_v6  ;;  %v260_v55 = vpop.f32.mrf.mxu2  ;;  %v289_v56 = vpop.f32.mrf.mxu3 }
 0x15f   :  { %v263_v57 = vpop.f32.mrf.mxu2  ;;  %v292_v5 = vpop.f32.mrf.mxu3 }
 0x1ba   :  { %v414_v58 = vpop.f32.mrf.mxu2  ;;  %v443_v59 = vpop.f32.mrf.mxu3 }
 0x1bc   :  { %v324_v60 = vpop.f32.mrf.mxu0  ;;  %v353_v61 = vpop.f32.mrf.mxu1 }
 0x1bd   :  { %v325_v4 = vadd.f32 %v324_v60, %v254_v51  ;;  %v354_v7 = vadd.f32 %v353_v61, %v283_v52 }
 0x1bf   :  { %v455_v18 = vadd.f32 %v414_v58, %v325_v4  ;;  %v456_v19 = vadd.f32 %v443_v59, %v354_v7 }
 0x1c1   :  { %v483_v31 = vadd.f32 %v466_v21, %v455_v18  ;;  %v484_v33 = vadd.f32 %v466_v21, %v456_v19 }
 0x1c3   :  { %v417_v62 = vpop.f32.mrf.mxu2  ;;  %v446_v63 = vpop.f32.mrf.mxu3  ;;  %v491_v49 = vmax.f32 %v483_v31, 0.0  ;;  %v492_v50 = vmax.f32 %v484_v33, 0.0 }
 0x1c4   :  { %v327_v0 = vpop.f32.mrf.mxu0  ;;  %v356_v1 = vpop.f32.mrf.mxu1 }
 0x1c5   :  { %v328_v2 = vadd.f32 %v327_v0, %v257_v53  ;;  %v357_v3 = vadd.f32 %v356_v1, %v286_v54  ;;  %v518_v54 = vmul.f32 32.0, %v1319_v44 }
 0x1c7   :  { %v457_v12 = vadd.f32 %v417_v62, %v328_v2  ;;  %v458_v13 = vadd.f32 %v446_v63, %v357_v3  ;;  %v519_v1 = vsub.f32 1.0, %v518_v54 }
 0x1c9   :  { %v485_v28 = vadd.f32 %v471_v20, %v457_v12  ;;  %v486_v29 = vadd.f32 %v471_v20, %v458_v13  ;;  %v520_v4 = vmul.f32 %v1319_v44, %v519_v1 }
 0x1cb   :  { %v420_v8 = vpop.f32.mrf.mxu2  ;;  %v449_v9 = vpop.f32.mrf.mxu3  ;;  %v493_v45 = vmax.f32 %v485_v28, 0.0  ;;  %v494_v46 = vmax.f32 %v486_v29, 0.0 }
 0x1cc   :  { %v330_v10 = vpop.f32.mrf.mxu0  ;;  %v359_v11 = vpop.f32.mrf.mxu1 }
 0x1cd   :  { %v331_v14 = vadd.f32 %v330_v10, %v260_v55  ;;  %v360_v16 = vadd.f32 %v359_v11, %v289_v56  ;;  %v481_v55 = vpop.permute.xlu2 %480  ;;  %v499_v56 = vadd.f32 %v493_v45, %v491_v49  ;;  %v508_v58 = vadd.f32 %v494_v46, %v492_v50 }
 0x1ce   :  { %v521_v11 = vadd.f32 %v1319_v44, %v520_v4 }
 0x1cf   :  { %v459_v22 = vadd.f32 %v420_v8, %v331_v14  ;;  %v460_v23 = vadd.f32 %v449_v9, %v360_v16 }
 0x1d0   :  { %v1574_v18 = vsel %vm522_vm13, %v1319_v44, %v521_v11 }
 0x1d1   :  { %v487_v34 = vadd.f32 %v476_v25, %v459_v22  ;;  %v488_v35 = vadd.f32 %v476_v25, %v460_v23 }
 0x1d3   :  { %v423_v36 = vpop.f32.mrf.mxu2  ;;  %v452_v41 = vpop.f32.mrf.mxu3  ;;  %v495_v6 = vmax.f32 %v487_v34, 0.0  ;;  %v496_v51 = vmax.f32 %v488_v35, 0.0 }
 0x1d4   :  { %v333_v42 = vpop.f32.mrf.mxu0  ;;  %v362_v43 = vpop.f32.mrf.mxu1 }
 0x1d5   :  { %v334_v47 = vadd.f32 %v333_v42, %v263_v57  ;;  %v363_v48 = vadd.f32 %v362_v43, %v292_v5  ;;  %v500_v61 = vadd.f32 %v499_v56, %v495_v6  ;;  %v509_v62 = vadd.f32 %v508_v58, %v496_v51  ;;  %v602_v4 = vpop.permute.xlu2 %601 }
 0x1d7   :  { %v461_v52 = vadd.f32 %v423_v36, %v334_v47  ;;  %v462_v53 = vadd.f32 %v452_v41, %v363_v48 }
 0x1d9   :  { %v489_v59 = vadd.f32 %v481_v55, %v461_v52  ;;  %v490_v60 = vadd.f32 %v481_v55, %v462_v53 }
 0x1db   :  { %v497_v63 = vmax.f32 %v489_v59, 0.0  ;;  %v498_v0 = vmax.f32 %v490_v60, 0.0 }
 0x1dd   :  { %v501_v2 = vadd.f32 %v500_v61, %v497_v63  ;;  %v510_v57 = vadd.f32 %v509_v62, %v498_v0 }
 0x1df   :  { %v502_v5 = vrot.slane %v501_v2, 4  ;;  %v511_v3 = vrot.slane %v510_v57, 4 }
 0x1e1   :  { %v503_v7 = vadd.f32 %v502_v5, %v501_v2  ;;  %v512_v8 = vadd.f32 %v511_v3, %v510_v57  ;;  %v606_v3 = vpop.permute.xlu1 %605 }
 0x1e3   :  { %v504_v9 = vrot.slane %v503_v7, 2  ;;  %v513_v10 = vrot.slane %v512_v8, 2 }
 0x1e5   :  { %v505_v12 = vadd.f32 %v504_v9, %v503_v7  ;;  %v514_v13 = vadd.f32 %v513_v10, %v512_v8 }
 0x1e7   :  { %v506_v14 = vrot.slane %v505_v12, 1  ;;  %v515_v16 = vrot.slane %v514_v13, 1 }
 0x1e9   :  { %v507_v19 = vadd.f32 %v506_v14, %v505_v12  ;;  %v516_v20 = vadd.f32 %v515_v16, %v514_v13  ;;  %v598_v12 = vpop.permute.xlu1 %597  ;;  %v626_v16 = vpop.permute.xlu2 %625 }
 0x1eb   :  { %v524_v21 = vmul.f32 %v1574_v18, %v507_v19  ;;  %v525_v22 = vmul.f32 %v1574_v18, %v516_v20 }
 0x1ed   :  { %v1578_v23 = vsub.f32 %v491_v49, %v524_v21  ;;  %v1580_v24 = vsub.f32 %v492_v50, %v525_v22  ;;  %v1582_v25 = vsub.f32 %v493_v45, %v524_v21  ;;  %v1584_v28 = vsub.f32 %v494_v46, %v525_v22 }
 0x1ee   :  { %v1586_v29 = vsub.f32 %v495_v6, %v524_v21  ;;  %v531_v31 = vsub.f32 %v496_v51, %v525_v22  ;;  %v532_v33 = vsub.f32 %v497_v63, %v524_v21  ;;  %v533_v34 = vsub.f32 %v498_v0, %v525_v22  ;;  %v630_v21 = vpop.permute.xlu0 %629 }
 0x1ef   :  { %v534_v35 = vmul.f32 %v1578_v23, %v1578_v23  ;;  %v535_v36 = vmul.f32 %v1580_v24, %v1580_v24  ;;  %v536_v41 = vmul.f32 %v1582_v25, %v1582_v25  ;;  %v537_v42 = vmul.f32 %v1584_v28, %v1584_v28 }
 0x1f0   :  { %v538_v43 = vmul.f32 %v1586_v29, %v1586_v29  ;;  %v539_v44 = vmul.f32 %v531_v31, %v531_v31  ;;  %v540_v47 = vmul.f32 %v532_v33, %v532_v33  ;;  %v541_v48 = vmul.f32 %v533_v34, %v533_v34 }
 0x1f1   :  { %v542_v45 = vadd.f32 %v536_v41, %v534_v35  ;;  %v551_v46 = vadd.f32 %v537_v42, %v535_v36 }
 0x1f3   :  { %v543_v49 = vadd.f32 %v542_v45, %v538_v43  ;;  %v552_v50 = vadd.f32 %v551_v46, %v539_v44 }
 0x1f5   :  { %v544_v6 = vadd.f32 %v543_v49, %v540_v47  ;;  %v553_v51 = vadd.f32 %v552_v50, %v541_v48  ;;  %v594_v50 = vpop.permute.xlu1 %593 }
 0x1f7   :  { %v545_v52 = vrot.slane %v544_v6, 4  ;;  %v554_v53 = vrot.slane %v553_v51, 4 }
 0x1f9   :  { %v546_v54 = vadd.f32 %v545_v52, %v544_v6  ;;  %v555_v55 = vadd.f32 %v554_v53, %v553_v51 }
 0x1fb   :  { %v547_v56 = vrot.slane %v546_v54, 2  ;;  %v556_v58 = vrot.slane %v555_v55, 2 }
 0x1fd   :  { %v548_v59 = vadd.f32 %v547_v56, %v546_v54  ;;  %v557_v60 = vadd.f32 %v556_v58, %v555_v55  ;;  %v622_v56 = vpop.permute.xlu2 %621 }
 0x1ff   :  { %v549_v61 = vrot.slane %v548_v59, 1  ;;  %v558_v62 = vrot.slane %v557_v60, 1 }
 0x201   :  { %v550_v63 = vadd.f32 %v549_v61, %v548_v59  ;;  %v559_v0 = vadd.f32 %v558_v62, %v557_v60  ;;  %v618_v60 = vpop.permute.xlu0 %617 }
 0x203   :  { %v561_v1 = vmul.f32 %v559_v0, %v1574_v18  ;;  %v560_v2 = vmul.f32 %v550_v63, %v1574_v18 }
 0x205   :  { %v563_v57 = vadd.f32 1e-05, %v561_v1  ;;  %v562_v5 = vadd.f32 1e-05, %v560_v2 }
 0x207   :  { %1320 = vrsqrt.f32 %v563_v57  ;;  %vm580_vm0 = vweird.f32 %v563_v57  ;;  %vm570_vm2 = vweird.f32 %v562_v5 }
 0x208   :  { %1322 = vrsqrt.f32 %v562_v5 }
 0x20d   :  { %v1321_v7 = vpop.eup %1320 }
 0x20e   :  { %v1323_v8 = vpop.eup %1322  ;;  %v575_v9 = vmul.f32 %v1321_v7, %v563_v57  ;;  %vm581_vm14 = vweird.f32 %v1321_v7 }
 0x20f   :  { %v565_v10 = vmul.f32 %v1323_v8, %v562_v5  ;;  %vm571_vm15 = vweird.f32 %v1323_v8  ;;  %vm582_vm1 = vmor %vm580_vm0, %vm581_vm14 }
 0x210   :  { %v576_v11 = vmul.f32 %v1321_v7, %v575_v9  ;;  %vm572_vm3 = vmor %vm570_vm2, %vm571_vm15  ;;  %v1230_v9 = vld [vmem:[%s1827_s5 + $0x30] sm:$0xff] }
 0x211   :  { %v566_v13 = vmul.f32 %v1323_v8, %v565_v10 }
 0x212   :  { %v577_v14 = vmul.f32 0.5, %v576_v11 }
 0x213   :  { %v567_v19 = vmul.f32 0.5, %v566_v13 }
 0x214   :  { %v578_v20 = vsub.f32 1.5, %v577_v14 }
 0x215   :  { %v568_v22 = vsub.f32 1.5, %v567_v19 }
 0x216   :  { %v579_v35 = vmul.f32 %v1321_v7, %v578_v20 }
 0x217   :  { %v569_v36 = vmul.f32 %v1323_v8, %v568_v22 }
 0x218   :  { %v583_v41 = vsel %vm582_vm1, %v1321_v7, %v579_v35  ;;  %v1229_v7 = vld [vmem:[%s1827_s5 + $0x28] sm:$0xff] }
 0x219   :  { %v591_v42 = vmul.f32 %v583_v41, %v533_v34  ;;  %v573_v43 = vsel %vm572_vm3, %v1323_v8, %v569_v36  ;;  %v589_v44 = vmul.f32 %v583_v41, %v531_v31  ;;  %v587_v45 = vmul.f32 %v583_v41, %v1584_v28 }
 0x21a   :  { %v590_v46 = vmul.f32 %v573_v43, %v532_v33  ;;  %v588_v47 = vmul.f32 %v573_v43, %v1586_v29  ;;  %v586_v48 = vmul.f32 %v573_v43, %v1582_v25  ;;  %v585_v49 = vmul.f32 %v583_v41, %v1580_v24 }
 0x21b   :  { %v615_v6 = vmul.f32 %v606_v3, %v591_v42  ;;  %v613_v51 = vmul.f32 %v602_v4, %v589_v44  ;;  %v611_v52 = vmul.f32 %v598_v12, %v587_v45  ;;  %v584_v53 = vmul.f32 %v573_v43, %v1578_v23  ;;  %v680_v43 = vld [vmem:[%s1827_s5] sm:$0xff] }
 0x21c   :  { %v614_v54 = vmul.f32 %v606_v3, %v590_v46  ;;  %v612_v55 = vmul.f32 %v602_v4, %v588_v47  ;;  %v610_v34 = vmul.f32 %v598_v12, %v586_v48  ;;  %v609_v28 = vmul.f32 %v594_v50, %v585_v49  ;;  %v1228_v4 = vld [vmem:[%s1827_s5 + $0x20] sm:$0xff]  ;;  %v681_v49 = vld [vmem:[%s1827_s5 + $0x8] sm:$0xff] }
 0x21d   :  { %v639_v31 = vadd.f32 %v630_v21, %v615_v6  ;;  %v637_v58 = vadd.f32 %v626_v16, %v613_v51  ;;  %v608_v29 = vmul.f32 %v594_v50, %v584_v53  ;;  %v635_v24 = vadd.f32 %v622_v56, %v611_v52 }
 0x21e   :  { %v638_v33 = vadd.f32 %v630_v21, %v614_v54  ;;  %v636_v59 = vadd.f32 %v626_v16, %v612_v55  ;;  %v634_v63 = vadd.f32 %v622_v56, %v610_v34  ;;  %v633_v0 = vadd.f32 %v618_v60, %v609_v28  ;;  %v1231_v16 = vld [vmem:[%s1827_s5 + $0x38] sm:$0xff]  ;;  %v682_v34 = vld [vmem:[%s1827_s5 + $0x10] sm:$0xff] }
 0x21f   :  { %v647_v25 = vmul.f32 %v639_v31, %v1439_v17  ;;  %v645_v23 = vmul.f32 %v637_v58, %v1439_v17  ;;  %v632_v1 = vadd.f32 %v618_v60, %v608_v29  ;;  %v643_v2 = vmul.f32 %v635_v24, %v1439_v17 }
 0x220   :  { %v646_v61 = vmul.f32 %v638_v33, %v1437_v15  ;;  %v644_v62 = vmul.f32 %v636_v59, %v1437_v15  ;;  %v642_v57 = vmul.f32 %v634_v63, %v1437_v15  ;;  %v641_v5 = vmul.f32 %v633_v0, %v1439_v17  ;;  %v1256_v59 = vld [vmem:[%s1827_s5 + $0x40] sm:$0xff] }
 0x221   :  { %662 = vrot.lane.b32.xlu2 %v647_v25, %s1359_s0  ;;  %743 = vmatpush.msra.mxu1 %v647_v25  ;;  %v640_v3 = vmul.f32 %v632_v1, %v1437_v15  ;;  %v1361_v53 = vmov 3   ;;  %v1362_v58 = vmov 4   ;;  %v1363_v24 = vmov 5  }
 0x222   :  { %654 = vrot.lane.b32.xlu1 %v646_v61, %s1359_s0  ;;  %714 = vmatpush.msra.mxu0 %v646_v61 }
 0x223   :  { %652 = vrot.lane.b32.xlu0 %v644_v62, %s1359_s0  ;;  %744 = vmatpush.msra.mxu1 %v645_v23 }
 0x224   :  { %715 = vmatpush.msra.mxu0 %v644_v62  ;;  %1300 = vset.pattern.permute.xlu0 %v1361_v53 }
 0x225   :  { %745 = vmatpush.msra.mxu1 %v643_v2  ;;  %1301 = vset.pattern.permute.xlu1 %v1361_v53 }
 0x226   :  { %716 = vmatpush.msra.mxu0 %v642_v57  ;;  %1299 = vset.pattern.permute.xlu2 %v1361_v53 }
 0x227   :  { %746 = vmatpush.msra.mxu1 %v641_v5 }
 0x228   :  { %717 = vmatpush.msra.mxu0 %v640_v3  ;;  %1236 = vmatmul.msk.f32.vlgmr.msra.gmra.mxu1 %vm689_vm4, %v1228_v4 }
 0x229   :  { %650 = vrot.lane.b32.xlu2 %v642_v57, %s1359_s0  ;;  %1232 = vmatmul.msk.f32.vlgmr.msra.gmra.mxu0 %vm689_vm4, %v1228_v4 }
 0x22a   :  { %660 = vrot.lane.b32.xlu1 %v645_v23, %s1359_s0 }
 0x22b   :  { %658 = vrot.lane.b32.xlu0 %v643_v2, %s1359_s0 }
 0x230   :  { %1237 = vmatmul.msk.f32.gmra.mxu1 %vm689_vm4, %v1229_v7 }
 0x231   :  { %656 = vrot.lane.b32.xlu2 %v641_v5, %s1359_s0  ;;  %1233 = vmatmul.msk.f32.gmra.mxu0 %vm689_vm4, %v1229_v7 }
 0x232   :  { %648 = vrot.lane.b32.xlu1 %v640_v3, %s1359_s0 }
 0x233   :  { %836 = vrot.lane.b32.xlu0 %v646_v61, %s1358_s17  ;;  %v1257_v61 = vld [vmem:[%s1827_s5 + $0x48] sm:$0xff] }
 0x238   :  { %1238 = vmatmul.msk.f32.gmra.mxu1 %vm689_vm4, %v1230_v9 }
 0x239   :  { %834 = vrot.lane.b32.xlu2 %v644_v62, %s1358_s17  ;;  %1234 = vmatmul.msk.f32.gmra.mxu0 %vm689_vm4, %v1230_v9  ;;  %v1364_v62 = vmov 6  }
 0x23a   :  { %844 = vrot.lane.b32.xlu1 %v647_v25, %s1358_s17  ;;  %v683_v25 = vld [vmem:[%s1827_s5 + $0x18] sm:$0xff] }
 0x23b   :  { %842 = vrot.lane.b32.xlu0 %v645_v23, %s1358_s17 }
 0x240   :  { %1239 = vmatmul.msk.f32.gmra.mxu1 %vm689_vm4, %v1231_v16 }
 0x241   :  { %840 = vrot.lane.b32.xlu2 %v643_v2, %s1358_s17  ;;  %1235 = vmatmul.msk.f32.gmra.mxu0 %vm689_vm4, %v1231_v16  ;;  %v1365_v2 = vmov 7  }
 0x242   :  { %832 = vrot.lane.b32.xlu1 %v642_v57, %s1358_s17  ;;  %v1153_v57 = vld [vmem:[%s1829_s7] sm:$0x1]  ;;  %s1366_s7 = smov [#allocation2]  }
 0x243   :  { %830 = vrot.lane.b32.xlu0 %v640_v3, %s1358_s17  ;;  %s1179_s20 = sshll.u32 %s1366_s7, 4  ;;  %s1180_s20 = int_to_ptr.vmem [resolvable:$true] %s1179_s20 }
 0x249   :  { %946 = vperm.xlu2 %1299, %v1503_v38  }
 0x24a   :  { %838 = vrot.lane.b32.xlu1 %v641_v5, %s1358_s17 }
 0x24b   :  { %950 = vperm.xlu0 %1300, %v1474_v30  }
 0x251   :  { %958 = vperm.xlu2 %1299, %v1510_v39  }
 0x252   :  { %954 = vperm.xlu1 %1301, %v1498_v37  }
 0x253   :  { %1304 = vset.pattern.permute.xlu0 %v1362_v58 }
 0x254   :  { %1072 = vperm.xlu0 %1304, %v1498_v37  }
 0x259   :  { %1303 = vset.pattern.permute.xlu2 %v1362_v58 }
 0x25a   :  { %1302 = vset.pattern.permute.xlu1 %v1362_v58  ;;  %1068 = vperm.xlu2 %1303, %v1474_v30  }
 0x25b   :  { %1064 = vperm.xlu1 %1302, %v1503_v38  }
 0x25c   :  { %1308 = vset.pattern.permute.xlu0 %v1364_v62 }
 0x25d   :  { %1112 = vperm.xlu0 %1308, %v1503_v38  }
 0x262   :  { %1306 = vset.pattern.permute.xlu2 %v1363_v24 }
 0x263   :  { %1305 = vset.pattern.permute.xlu1 %v1363_v24  ;;  %1092 = vperm.xlu2 %1306, %v1474_v30  }
 0x264   :  { %1088 = vperm.xlu1 %1305, %v1503_v38  }
 0x265   :  { %1311 = vset.pattern.permute.xlu0 %v1365_v2 }
 0x266   :  { %1156 = vperm.xlu0 %1311, %v1153_v57  }
 0x26b   :  { %1096 = vperm.xlu2 %1306, %v1498_v37  }
 0x26c   :  { %1307 = vset.pattern.permute.xlu1 %v1362_v58 }
 0x26d   :  { %1076 = vperm.xlu1 %1307, %v1510_v39  }
 0x273   :  { %1100 = vperm.xlu2 %1306, %v1510_v39  }
 0x275   :  { %1309 = vset.pattern.permute.xlu1 %v1364_v62 }
 0x276   :  { %1116 = vperm.xlu1 %1309, %v1474_v30  }
 0x27b   :  { %v663_v8 = vpop.permute.xlu2 %662  ;;  %1310 = vset.pattern.permute.xlu2 %v1364_v62 }
 0x27c   :  { %1124 = vperm.xlu2 %1310, %v1510_v39  }
 0x27e   :  { %1120 = vperm.xlu1 %1309, %v1498_v37  }
 0x283   :  { %v651_v14 = vpop.permute.xlu2 %650 }
 0x28b   :  { %v657_v41 = vpop.permute.xlu2 %656 }
 0x293   :  { %v835_v47 = vpop.permute.xlu2 %834 }
 0x294   :  { %v655_v10 = vpop.permute.xlu1 %654 }
 0x295   :  { %v667_v11 = vsel %vm205_vm10, %v655_v10, %v663_v8  ;;  %v671_v12 = vsel %vm205_vm10, %v663_v8, %v655_v10  ;;  %v653_v13 = vpop.permute.xlu0 %652 }
 0x296   :  { %1240 = vmatpush.msk.msra.mxu2 %vm208_vm11, %v671_v12  ;;  %1248 = vmatpush.msk.msra.mxu3 %vm1516_vm12, %v667_v11 }
 0x29b   :  { %v841_v54 = vpop.permute.xlu2 %840 }
 0x29c   :  { %v661_v19 = vpop.permute.xlu1 %660 }
 0x29d   :  { %v666_v20 = vsel %vm205_vm10, %v653_v13, %v661_v19  ;;  %v670_v21 = vsel %vm205_vm10, %v661_v19, %v653_v13  ;;  %v659_v22 = vpop.permute.xlu0 %658 }
 0x29e   :  { %1241 = vmatpush.msk.msra.mxu2 %vm208_vm11, %v670_v21  ;;  %1249 = vmatpush.msk.msra.mxu3 %vm1516_vm12, %v666_v20  ;;  %v665_v35 = vsel %vm205_vm10, %v651_v14, %v659_v22  ;;  %v669_v36 = vsel %vm205_vm10, %v659_v22, %v651_v14 }
 0x2a0   :  { %1242 = vmatpush.msk.msra.mxu2 %vm208_vm11, %v669_v36  ;;  %1250 = vmatpush.msk.msra.mxu3 %vm1516_vm12, %v665_v35 }
 0x2a4   :  { %v649_v42 = vpop.permute.xlu1 %648 }
 0x2a5   :  { %v837_v44 = vpop.permute.xlu0 %836  ;;  %v664_v45 = vsel %vm205_vm10, %v649_v42, %v657_v41  ;;  %v668_v46 = vsel %vm205_vm10, %v657_v41, %v649_v42  ;;  %v748_v23 = vpop.f32.mrf.mxu1 }
 0x2a6   :  { %1243 = vmatpush.msk.msra.mxu2 %vm208_vm11, %v668_v46  ;;  %1251 = vmatpush.msk.msra.mxu3 %vm1516_vm12, %v664_v45  ;;  %v719_v63 = vpop.f32.mrf.mxu0  ;;  %v947_v46 = vpop.permute.xlu2 %946  ;;  %vm1166_vm11 = vcmask 1040384   ;;  %vm1171_vm12 = vcmp.lt.s32.totalorder %v35_v26, 256 }
 0x2a7   :  { %1252 = vmatmul.msk.f32.vlgmr.msra.gmra.mxu3 %vm689_vm4, %v680_v43  ;;  %1244 = vmatmul.msk.f32.vlgmr.msra.gmra.mxu2 %vm689_vm4, %v680_v43 }
 0x2ac   :  { %v845_v48 = vpop.permute.xlu1 %844 }
 0x2ad   :  { %v843_v50 = vpop.permute.xlu0 %842  ;;  %v849_v6 = vsel %vm369_vm8, %v837_v44, %v845_v48  ;;  %v853_v51 = vsel %vm369_vm8, %v845_v48, %v837_v44  ;;  %v751_v1 = vpop.f32.mrf.mxu1 }
 0x2ae   :  { %1260 = vmatpush.msk.msrb.mxu0 %vm369_vm8, %v849_v6  ;;  %1268 = vmatpush.msk.msrb.mxu1 %vm1478_vm9, %v853_v51  ;;  %v848_v40 = vsel %vm369_vm8, %v835_v47, %v843_v50  ;;  %v852_v52 = vsel %vm369_vm8, %v843_v50, %v835_v47  ;;  %v722_v0 = vpop.f32.mrf.mxu0 }
 0x2af   :  { %1253 = vmatmul.msk.f32.gmra.mxu3 %vm689_vm4, %v681_v49  ;;  %1245 = vmatmul.msk.f32.gmra.mxu2 %vm689_vm4, %v681_v49 }
 0x2b0   :  { %1261 = vmatpush.msk.msrb.mxu0 %vm369_vm8, %v848_v40  ;;  %1269 = vmatpush.msk.msrb.mxu1 %vm1478_vm9, %v852_v52 }
 0x2b4   :  { %v833_v55 = vpop.permute.xlu1 %832 }
 0x2b5   :  { %v847_v56 = vsel %vm369_vm8, %v833_v55, %v841_v54  ;;  %v851_v31 = vsel %vm369_vm8, %v841_v54, %v833_v55  ;;  %v831_v28 = vpop.permute.xlu0 %830  ;;  %v754_v38 = vpop.f32.mrf.mxu1 }
 0x2b6   :  { %1262 = vmatpush.msk.msrb.mxu0 %vm369_vm8, %v847_v56  ;;  %1270 = vmatpush.msk.msrb.mxu1 %vm1478_vm9, %v851_v31  ;;  %v725_v30 = vpop.f32.mrf.mxu0 }
 0x2b7   :  { %1254 = vmatmul.msk.f32.gmra.mxu3 %vm689_vm4, %v682_v34  ;;  %1246 = vmatmul.msk.f32.gmra.mxu2 %vm689_vm4, %v682_v34 }
 0x2bc   :  { %v839_v33 = vpop.permute.xlu1 %838 }
 0x2bd   :  { %v846_v29 = vsel %vm369_vm8, %v831_v28, %v839_v33  ;;  %v850_v60 = vsel %vm369_vm8, %v839_v33, %v831_v28  ;;  %v757_v37 = vpop.f32.mrf.mxu1  ;;  %v951_v35 = vpop.permute.xlu0 %950 }
 0x2be   :  { %1263 = vmatpush.msk.msrb.mxu0 %vm369_vm8, %v846_v29  ;;  %1271 = vmatpush.msk.msrb.mxu1 %vm1478_vm9, %v850_v60  ;;  %v728_v4 = vpop.f32.mrf.mxu0 }
 0x2bf   :  { %1264 = vmatmul.msk.f32.vlgmr.msrb.gmra.mxu0 %vm689_vm4, %v1256_v59  ;;  %1272 = vmatmul.msk.f32.vlgmr.msrb.gmra.mxu1 %vm689_vm4, %v1256_v59 }
 0x2c0   :  { %1255 = vmatmul.msk.f32.gmra.mxu3 %vm689_vm4, %v683_v25  ;;  %1247 = vmatmul.msk.f32.gmra.mxu2 %vm689_vm4, %v683_v25 }
 0x2c4   :  { %v955_v49 = vpop.permute.xlu1 %954 }
 0x2c7   :  { %1265 = vmatmul.msk.f32.gmra.mxu0 %vm689_vm4, %v1257_v61  ;;  %1273 = vmatmul.msk.f32.gmra.mxu1 %vm689_vm4, %v1257_v61 }
 0x2cf   :  { %1266 = vmatmul.msk.f32.gmra.mxu0 %vm689_vm4, %v1258_v27  ;;  %1274 = vmatmul.msk.f32.gmra.mxu1 %vm689_vm4, %v1258_v27  ;;  %v959_v27 = vpop.permute.xlu2 %958 }
 0x2d7   :  { %1267 = vmatmul.msk.f32.gmra.mxu0 %vm689_vm4, %v1259_v32  ;;  %1275 = vmatmul.msk.f32.gmra.mxu1 %vm689_vm4, %v1259_v32 }
 0x32a   :  { %v818_v5 = vpop.f32.mrf.mxu3  ;;  %v789_v3 = vpop.f32.mrf.mxu2 }
 0x32b   :  { %v819_v19 = vadd.f32 %v818_v5, %v748_v23  ;;  %v790_v20 = vadd.f32 %v789_v3, %v719_v63 }
 0x332   :  { %v821_v7 = vpop.f32.mrf.mxu3  ;;  %v792_v8 = vpop.f32.mrf.mxu2 }
 0x333   :  { %v822_v14 = vadd.f32 %v821_v7, %v751_v1  ;;  %v793_v16 = vadd.f32 %v792_v8, %v722_v0 }
 0x33a   :  { %v824_v12 = vpop.f32.mrf.mxu3  ;;  %v795_v13 = vpop.f32.mrf.mxu2 }
 0x33b   :  { %v825_v36 = vadd.f32 %v824_v12, %v754_v38  ;;  %v796_v41 = vadd.f32 %v795_v13, %v725_v30 }
 0x33c   :  { %v896_v39 = vpop.f32.mrf.mxu0  ;;  %v925_v9 = vpop.f32.mrf.mxu1 }
 0x33d   :  { %v937_v42 = vadd.f32 %v896_v39, %v790_v20  ;;  %v938_v43 = vadd.f32 %v925_v9, %v819_v19 }
 0x33f   :  { %v961_v51 = vadd.f32 %v947_v46, %v937_v42  ;;  %v962_v40 = vadd.f32 %v947_v46, %v938_v43 }
 0x341   :  { %v969_v28 = vmax.f32 %v961_v51, 0.0  ;;  %v970_v33 = vmax.f32 %v962_v40, 0.0 }
 0x343   :  { %v827_v52 = vpop.f32.mrf.mxu3  ;;  %v798_v53 = vpop.f32.mrf.mxu2 }
 0x344   :  { %v899_v10 = vpop.f32.mrf.mxu0  ;;  %v928_v11 = vpop.f32.mrf.mxu1  ;;  %v828_v31 = vadd.f32 %v827_v52, %v757_v37  ;;  %v799_v58 = vadd.f32 %v798_v53, %v728_v4 }
 0x345   :  { %v939_v21 = vadd.f32 %v899_v10, %v793_v16  ;;  %v940_v22 = vadd.f32 %v928_v11, %v822_v14 }
 0x347   :  { %v963_v50 = vadd.f32 %v951_v35, %v939_v21  ;;  %v964_v6 = vadd.f32 %v951_v35, %v940_v22 }
 0x349   :  { %v971_v34 = vmax.f32 %v963_v50, 0.0  ;;  %v972_v56 = vmax.f32 %v964_v6, 0.0 }
 0x34b   :  { %v977_v32 = vadd.f32 %v971_v34, %v969_v28  ;;  %v986_v62 = vadd.f32 %v972_v56, %v970_v33 }
 0x34c   :  { %v902_v44 = vpop.f32.mrf.mxu0  ;;  %v931_v45 = vpop.f32.mrf.mxu1 }
 0x34d   :  { %v941_v47 = vadd.f32 %v902_v44, %v796_v41  ;;  %v942_v48 = vadd.f32 %v931_v45, %v825_v36 }
 0x34f   :  { %v965_v54 = vadd.f32 %v955_v49, %v941_v47  ;;  %v966_v55 = vadd.f32 %v955_v49, %v942_v48 }
 0x351   :  { %v973_v60 = vmax.f32 %v965_v54, 0.0  ;;  %v974_v25 = vmax.f32 %v966_v55, 0.0 }
 0x353   :  { %v978_v0 = vadd.f32 %v977_v32, %v973_v60  ;;  %v987_v1 = vadd.f32 %v986_v62, %v974_v25 }
 0x354   :  { %v905_v59 = vpop.f32.mrf.mxu0  ;;  %v934_v29 = vpop.f32.mrf.mxu1 }
 0x355   :  { %v943_v24 = vadd.f32 %v905_v59, %v799_v58  ;;  %v944_v61 = vadd.f32 %v934_v29, %v828_v31 }
 0x357   :  { %v967_v63 = vadd.f32 %v959_v27, %v943_v24  ;;  %v968_v23 = vadd.f32 %v959_v27, %v944_v61 }
 0x359   :  { %v975_v2 = vmax.f32 %v967_v63, 0.0  ;;  %v976_v57 = vmax.f32 %v968_v23, 0.0 }
 0x35b   :  { %v979_v30 = vadd.f32 %v978_v0, %v975_v2  ;;  %v988_v38 = vadd.f32 %v987_v1, %v976_v57 }
 0x35d   :  { %v980_v5 = vrot.slane %v979_v30, 4  ;;  %v989_v3 = vrot.slane %v988_v38, 4 }
 0x35f   :  { %v981_v4 = vadd.f32 %v980_v5, %v979_v30  ;;  %v990_v37 = vadd.f32 %v989_v3, %v988_v38 }
 0x361   :  { %v982_v7 = vrot.slane %v981_v4, 2  ;;  %v991_v8 = vrot.slane %v990_v37, 2 }
 0x363   :  { %v983_v39 = vadd.f32 %v982_v7, %v981_v4  ;;  %v992_v9 = vadd.f32 %v991_v8, %v990_v37  ;;  %v1073_v8 = vpop.permute.xlu0 %1072 }
 0x365   :  { %v984_v10 = vrot.slane %v983_v39, 1  ;;  %v993_v11 = vrot.slane %v992_v9, 1 }
 0x367   :  { %v985_v12 = vadd.f32 %v984_v10, %v983_v39  ;;  %v994_v13 = vadd.f32 %v993_v11, %v992_v9 }
 0x369   :  { %v995_v14 = vmul.f32 %v985_v12, %v1574_v18  ;;  %v996_v16 = vmul.f32 %v994_v13, %v1574_v18 }
 0x36b   :  { %v1774_v19 = vsub.f32 %v969_v28, %v995_v14  ;;  %v1776_v20 = vsub.f32 %v970_v33, %v996_v16  ;;  %v1778_v21 = vsub.f32 %v971_v34, %v995_v14  ;;  %v1780_v22 = vsub.f32 %v972_v56, %v996_v16  ;;  %v1065_v56 = vpop.permute.xlu1 %1064  ;;  %v1069_v28 = vpop.permute.xlu2 %1068 }
 0x36c   :  { %v1782_v35 = vsub.f32 %v973_v60, %v995_v14  ;;  %v1784_v36 = vsub.f32 %v974_v25, %v996_v16  ;;  %v1790_v43 = vsub.f32 %v975_v2, %v995_v14  ;;  %v1792_v44 = vsub.f32 %v976_v57, %v996_v16 }
 0x36d   :  { %v1005_v41 = vmul.f32 %v1774_v19, %v1774_v19  ;;  %v1006_v42 = vmul.f32 %v1776_v20, %v1776_v20  ;;  %v1007_v45 = vmul.f32 %v1778_v21, %v1778_v21  ;;  %v1008_v46 = vmul.f32 %v1780_v22, %v1780_v22 }
 0x36e   :  { %v1009_v47 = vmul.f32 %v1782_v35, %v1782_v35  ;;  %v1010_v48 = vmul.f32 %v1784_v36, %v1784_v36  ;;  %v1011_v6 = vmul.f32 %v1790_v43, %v1790_v43  ;;  %v1012_v51 = vmul.f32 %v1792_v44, %v1792_v44 }
 0x36f   :  { %v1013_v49 = vadd.f32 %v1007_v45, %v1005_v41  ;;  %v1022_v50 = vadd.f32 %v1008_v46, %v1006_v42 }
 0x371   :  { %v1014_v40 = vadd.f32 %v1013_v49, %v1009_v47  ;;  %v1023_v52 = vadd.f32 %v1022_v50, %v1010_v48 }
 0x373   :  { %v1015_v53 = vadd.f32 %v1014_v40, %v1011_v6  ;;  %v1024_v54 = vadd.f32 %v1023_v52, %v1012_v51  ;;  %v1089_v32 = vpop.permute.xlu1 %1088  ;;  %v1093_v23 = vpop.permute.xlu2 %1092 }
 0x375   :  { %v1016_v55 = vrot.slane %v1015_v53, 4  ;;  %v1025_v34 = vrot.slane %v1024_v54, 4 }
 0x377   :  { %v1017_v31 = vadd.f32 %v1016_v55, %v1015_v53  ;;  %v1026_v58 = vadd.f32 %v1025_v34, %v1024_v54 }
 0x379   :  { %v1018_v33 = vrot.slane %v1017_v31, 2  ;;  %v1027_v59 = vrot.slane %v1026_v58, 2 }
 0x37b   :  { %v1019_v29 = vadd.f32 %v1018_v33, %v1017_v31  ;;  %v1028_v60 = vadd.f32 %v1027_v59, %v1026_v58  ;;  %v1077_v2 = vpop.permute.xlu1 %1076  ;;  %v1097_v5 = vpop.permute.xlu2 %1096 }
 0x37d   :  { %v1020_v25 = vrot.slane %v1019_v29, 1  ;;  %v1029_v24 = vrot.slane %v1028_v60, 1 }
 0x37f   :  { %v1021_v61 = vadd.f32 %v1020_v25, %v1019_v29  ;;  %v1030_v27 = vadd.f32 %v1029_v24, %v1028_v60 }
 0x381   :  { %v1031_v62 = vmul.f32 %v1021_v61, %v1574_v18  ;;  %v1032_v63 = vmul.f32 %v1030_v27, %v1574_v18 }
 0x383   :  { %v1033_v0 = vadd.f32 1e-05, %v1031_v62  ;;  %v1034_v1 = vadd.f32 1e-05, %v1032_v63  ;;  %v1117_v11 = vpop.permute.xlu1 %1116  ;;  %v1101_v14 = vpop.permute.xlu2 %1100 }
 0x385   :  { %1324 = vrsqrt.f32 %v1033_v0  ;;  %vm1041_vm7 = vweird.f32 %v1033_v0  ;;  %vm1051_vm9 = vweird.f32 %v1034_v1 }
 0x386   :  { %1326 = vrsqrt.f32 %v1034_v1 }
 0x38b   :  { %v1325_v57 = vpop.eup %1324  ;;  %v1125_v60 = vpop.permute.xlu2 %1124 }
 0x38c   :  { %v1327_v30 = vpop.eup %1326  ;;  %v1036_v38 = vmul.f32 %v1325_v57, %v1033_v0  ;;  %vm1042_vm5 = vweird.f32 %v1325_v57 }
 0x38d   :  { %v1046_v3 = vmul.f32 %v1327_v30, %v1034_v1  ;;  %vm1052_vm6 = vweird.f32 %v1327_v30  ;;  %vm1043_vm8 = vmor %vm1041_vm7, %vm1042_vm5 }
 0x38e   :  { %v1037_v4 = vmul.f32 %v1325_v57, %v1036_v38  ;;  %vm1053_vm10 = vmor %vm1051_vm9, %vm1052_vm6 }
 0x38f   :  { %v1047_v37 = vmul.f32 %v1327_v30, %v1046_v3 }
 0x390   :  { %v1038_v7 = vmul.f32 0.5, %v1037_v4 }
 0x391   :  { %v1048_v39 = vmul.f32 0.5, %v1047_v37 }
 0x392   :  { %v1039_v9 = vsub.f32 1.5, %v1038_v7 }
 0x393   :  { %v1049_v10 = vsub.f32 1.5, %v1048_v39 }
 0x394   :  { %v1040_v18 = vmul.f32 %v1325_v57, %v1039_v9 }
 0x395   :  { %v1050_v12 = vmul.f32 %v1327_v30, %v1049_v10 }
 0x396   :  { %v1044_v13 = vsel %vm1043_vm8, %v1325_v57, %v1040_v18 }
 0x397   :  { %v1054_v16 = vsel %vm1053_vm10, %v1327_v30, %v1050_v12  ;;  %v1057_v41 = vmul.f32 %v1044_v13, %v1778_v21  ;;  %v1055_v42 = vmul.f32 %v1044_v13, %v1774_v19  ;;  %v1061_v45 = vmul.f32 %v1044_v13, %v1790_v43  ;;  %v1113_v19 = vpop.permute.xlu0 %1112 }
 0x398   :  { %v1058_v46 = vmul.f32 %v1054_v16, %v1780_v22  ;;  %v1056_v47 = vmul.f32 %v1054_v16, %v1776_v20  ;;  %v1062_v48 = vmul.f32 %v1054_v16, %v1792_v44  ;;  %v1059_v49 = vmul.f32 %v1044_v13, %v1782_v35 }
 0x399   :  { %v1081_v50 = vmul.f32 %v1069_v28, %v1057_v41  ;;  %v1079_v6 = vmul.f32 %v1065_v56, %v1055_v42  ;;  %v1085_v51 = vmul.f32 %v1077_v2, %v1061_v45  ;;  %v1060_v40 = vmul.f32 %v1054_v16, %v1784_v36  ;;  %v1121_v36 = vpop.permute.xlu1 %1120 }
 0x39a   :  { %v1082_v52 = vmul.f32 %v1069_v28, %v1058_v46  ;;  %v1080_v53 = vmul.f32 %v1065_v56, %v1056_v47  ;;  %v1086_v21 = vmul.f32 %v1077_v2, %v1062_v48  ;;  %v1083_v54 = vmul.f32 %v1073_v8, %v1059_v49 }
 0x39b   :  { %v1105_v55 = vadd.f32 %v1093_v23, %v1081_v50  ;;  %v1103_v43 = vadd.f32 %v1089_v32, %v1079_v6  ;;  %v1084_v34 = vmul.f32 %v1073_v8, %v1060_v40  ;;  %v1109_v58 = vadd.f32 %v1101_v14, %v1085_v51 }
 0x39c   :  { %v1106_v22 = vadd.f32 %v1093_v23, %v1082_v52  ;;  %v1104_v31 = vadd.f32 %v1089_v32, %v1080_v53  ;;  %v1107_v20 = vadd.f32 %v1097_v5, %v1083_v54  ;;  %v1110_v59 = vadd.f32 %v1101_v14, %v1086_v21 }
 0x39d   :  { %v1129_v44 = vmul.f32 %v1117_v11, %v1105_v55  ;;  %v1127_v33 = vmul.f32 %v1113_v19, %v1103_v43  ;;  %v1108_v35 = vadd.f32 %v1097_v5, %v1084_v34  ;;  %v1133_v27 = vmul.f32 %v1125_v60, %v1109_v58 }
 0x39e   :  { %v1130_v29 = vmul.f32 %v1117_v11, %v1106_v22  ;;  %v1128_v25 = vmul.f32 %v1113_v19, %v1104_v31  ;;  %v1131_v56 = vmul.f32 %v1121_v36, %v1107_v20  ;;  %v1134_v63 = vmul.f32 %v1125_v60, %v1110_v59 }
 0x39f   :  { %v1135_v28 = vadd.f32 %v1129_v44, %v1127_v33  ;;  %v1132_v61 = vmul.f32 %v1121_v36, %v1108_v35  ;;  %v1157_v8 = vpop.permute.xlu0 %1156 }
 0x3a0   :  { %v1144_v24 = vadd.f32 %v1130_v29, %v1128_v25 }
 0x3a1   :  { %v1136_v62 = vadd.f32 %v1135_v28, %v1131_v56 }
 0x3a2   :  { %v1145_v0 = vadd.f32 %v1144_v24, %v1132_v61 }
 0x3a3   :  { %v1137_v23 = vadd.f32 %v1136_v62, %v1133_v27 }
 0x3a4   :  { %v1146_v32 = vadd.f32 %v1145_v0, %v1134_v63 }
 0x3a5   :  { %v1138_v1 = vrot.slane %v1137_v23, 4 }
 0x3a6   :  { %v1147_v2 = vrot.slane %v1146_v32, 4 }
 0x3a7   :  { %v1139_v57 = vadd.f32 %v1138_v1, %v1137_v23 }
 0x3a8   :  { %v1148_v30 = vadd.f32 %v1147_v2, %v1146_v32 }
 0x3a9   :  { %v1140_v38 = vrot.slane %v1139_v57, 2 }
 0x3aa   :  { %v1149_v5 = vrot.slane %v1148_v30, 2 }
 0x3ab   :  { %v1141_v3 = vadd.f32 %v1140_v38, %v1139_v57 }
 0x3ac   :  { %v1150_v4 = vadd.f32 %v1149_v5, %v1148_v30 }
 0x3ad   :  { %v1142_v37 = vrot.slane %v1141_v3, 1 }
 0x3ae   :  { %v1151_v7 = vrot.slane %v1150_v4, 1 }
 0x3af   :  { %v1143_v39 = vadd.f32 %v1142_v37, %v1141_v3 }
 0x3b0   :  { %v1152_v9 = vadd.f32 %v1151_v7, %v1150_v4 }
 0x3b1   :  { %v1159_v10 = vadd.f32 %v1157_v8, %v1143_v39 }
 0x3b2   :  { %v1160_v18 = vadd.f32 %v1157_v8, %v1152_v9 }
 0x3b3   :  { %v1161_v12 = vmul.f32 %v1159_v10, %v1437_v15 }
 0x3b4   :  { %v1162_v11 = vmul.f32 %v1160_v18, %v1439_v17 }
 0x3b6   :  { %v1165_v13 = vrot.slane %v1162_v11, 7 }
 0x3b8   :  { %v1167_v14 = vsel %vm1166_vm11, %v1161_v12, %v1165_v13 }
 0x3b9   :  { %1173 = vst.msk [vmem:[#allocation2] sm:$0x3] %vm1171_vm12, %v1167_v14 }
 0x3ba   :  { %1184 = dma.vmem_to_hbm [thread:$0]  %s1180_s20, 32, %s1182_s4, [#allocation3]  }
 0x3bb   :  { %1352 = dma.done.wait [#allocation3], 32  }
 0x3bc   :  { %1353 = vsyncadd [#allocation3], 4294967264 }
 0x3bd   :  { %1189 = vsyncpa [#allocation3], 1 }

</bundles_post_ra>
